<compile_context>
chip_gen: v5e
topology: v5e:2x2
jax: 0.10.0
libtpu: 0.0.40
codegen_flags: <defaults>
</compile_context>

<pallas_src>
import jax
import jax.numpy as jnp
from jax.experimental import pallas as pl
from jax.experimental.pallas import tpu as pltpu

ALPHA = 0.5
SMOOTH = 1e-6
# Deterministic per-class weights (stand-in for the global BCE_WEIGHTS of the repo).
BCE_WEIGHTS = [0.2, 0.3, 0.1, 0.4]


def _make_kernel(C, tile_p, S):
    """Build the kernel closure for static (C, tile_p, S)."""
    needs_mask = (S % tile_p) != 0

    def kernel(x_ref, t_ref,                    # inputs  : (1, C, tile_p) tiles
               ce_ref, pt_ref, i_ref,           # outputs : (1, C, 1), (1, 1, 1), (1, 1, 1)
               acc_ce, acc_pt, acc_i):          # scratch : (C, tile_p) f32 x3
        s = pl.program_id(1)

        @pl.when(s == 0)
        def _init():
            acc_ce[...] = jnp.zeros_like(acc_ce)
            acc_pt[...] = jnp.zeros_like(acc_pt)
            acc_i[...] = jnp.zeros_like(acc_i)

        x = x_ref[0].astype(jnp.float32)   # (C, tile_p) logits, classes on sublanes
        t = t_ref[0].astype(jnp.float32)   # (C, tile_p) one-hot / prob targets

        # --- log-softmax over the class (sublane) axis, per position (lane) ---
        m = jnp.max(x, axis=0, keepdims=True)                       # (1, tile_p)
        z = x - m
        lse = jnp.log(jnp.sum(jnp.exp(z), axis=0, keepdims=True))   # (1, tile_p)
        nlogp = lse - z                                             # -log_softmax, (C, tile_p)

        # --- dice components on sigmoid(logits) ---
        p = jax.nn.sigmoid(x)                                       # (C, tile_p)

        ce_e = t * nlogp                                            # unweighted CE elements
        i_e = p * t                                                 # dice intersection
        pt_e = p + t                                                # dice denominator terms

        if needs_mask:
            # Only the last s-tile can be partial; mask invalid lanes AFTER the math so
            # any garbage in the padded region cannot leak NaN/Inf into the sums.
            valid = S - s * tile_p
            lane = jax.lax.broadcasted_iota(jnp.int32, (C, tile_p), 1)
            mask = lane < valid
            zero = jnp.float32(0.0)
            ce_e = jnp.where(mask, ce_e, zero)
            i_e = jnp.where(mask, i_e, zero)
            pt_e = jnp.where(mask, pt_e, zero)

        # Element-wise accumulation (pure VPU adds; no per-step cross-lane reduction).
        acc_ce[...] += ce_e
        acc_pt[...] += pt_e
        acc_i[...] += i_e

        @pl.when(s == pl.num_programs(1) - 1)
        def _finalize():
            # One final reduction + tiny per-batch output stores.
            ce_ref[0] = jnp.sum(acc_ce[...], axis=1, keepdims=True)   # (C, 1) per-class CE
            pt_ref[0] = jnp.sum(acc_pt[...], keepdims=True)           # (1, 1) sum p + sum t
            i_ref[0] = jnp.sum(acc_i[...], keepdims=True)             # (1, 1) sum p*t

    return kernel


def combined_loss(y_pred, y_true, weights=BCE_WEIGHTS, alpha=ALPHA, smooth=SMOOTH,
                  tile_p=32768):
    """y_pred, y_true: (N, C, D, H, W); y_true is one-hot / probability targets."""
    N, C = int(y_pred.shape[0]), int(y_pred.shape[1])
    S = 1
    for d in y_pred.shape[2:]:
        S *= int(d)

    # Free reshape (no transpose, no dtype change): positions land on the lane axis.
    x = y_pred.reshape(N, C, S)
    t = y_true.reshape(N, C, S)

    # VMEM-aware tile choice: double-buffered input tiles + 3 f32 accumulators under budget.
    in_bytes = jnp.dtype(y_pred.dtype).itemsize + jnp.dtype(y_true.dtype).itemsize
    per_pos = C * (2 * in_bytes + 3 * 4)
    budget = 12 * 1024 * 1024
    tp_cap = max(128, (int(budget // per_pos) // 128) * 128)
    tp = min(int(tile_p), tp_cap)
    if S <= tp:
        tp = S                                   # full axis: no (8,128) divisibility needed
    else:
        tp = max(128, (tp // 128) * 128)         # multiple of 128; last tile lane-masked
    num_s = pl.cdiv(S, tp)

    out_shape = (
        jax.ShapeDtypeStruct((N, C, 1), jnp.float32),   # per-batch per-class CE sums
        jax.ShapeDtypeStruct((N, 1, 1), jnp.float32),   # per-batch sum sigmoid(pred) + target
        jax.ShapeDtypeStruct((N, 1, 1), jnp.float32),   # per-batch sum sigmoid(pred) * target
    )

    grid_spec = pltpu.PrefetchScalarGridSpec(
        num_scalar_prefetch=0,
        grid=(N, num_s),
        in_specs=[
            pl.BlockSpec((1, C, tp), lambda n, s: (n, 0, s)),   # logits tile
            pl.BlockSpec((1, C, tp), lambda n, s: (n, 0, s)),   # target tile
        ],
        out_specs=[
            pl.BlockSpec((1, C, 1), lambda n, s: (n, 0, 0)),
            pl.BlockSpec((1, 1, 1), lambda n, s: (n, 0, 0)),
            pl.BlockSpec((1, 1, 1), lambda n, s: (n, 0, 0)),
        ],
        scratch_shapes=[pltpu.VMEM((C, tp), jnp.float32) for _ in range(3)],
    )

    ce_cls, pt_sum, i_sum = pl.pallas_call(
        _make_kernel(C, tp, S),
        out_shape=out_shape,
        grid_spec=grid_spec,
        compiler_params=pltpu.CompilerParams(
            dimension_semantics=("parallel", "arbitrary"),
            vmem_limit_bytes=32 * 1024 * 1024),
    )(x, t)

    # Scalar glue: apply class weights, normalize CE, combine with dice.
    w = jnp.asarray(weights, jnp.float32).reshape(1, C)
    total_pos = N * S
    ce = jnp.sum(ce_cls[:, :, 0] * w) / total_pos           # CE mean over N*D*H*W positions
    inter = jnp.sum(i_sum)
    denom = jnp.sum(pt_sum)
    dice = (2.0 * inter + smooth) / (denom + smooth)
    return alpha * ce + (1.0 - alpha) * (1.0 - dice)


def _reference_loss(y_pred, y_true, weights=BCE_WEIGHTS, alpha=ALPHA, smooth=SMOOTH):
    """Pure-JAX reference mirroring the PyTorch module."""
    x = y_pred.astype(jnp.float32)
    t = y_true.astype(jnp.float32)
    w = jnp.asarray(weights, jnp.float32).reshape(1, -1, 1, 1, 1)
    logp = jax.nn.log_softmax(x, axis=1)
    ce_per_pos = -jnp.sum(w * t * logp, axis=1)          # (N, D, H, W)
    ce = jnp.mean(ce_per_pos)
    p = jax.nn.sigmoid(x)
    inter = jnp.sum(p * t)
    dice = (2.0 * inter + smooth) / (jnp.sum(p) + jnp.sum(t) + smooth)
    return alpha * ce + (1.0 - alpha) * (1.0 - dice)


if __name__ == "__main__":
    key = jax.random.PRNGKey(0)
    k1, k2 = jax.random.split(key)

    N, C, D, H, W = 2, 4, 16, 16, 16   # small 3D-UNet-style volume, C matches BCE_WEIGHTS
    y_pred = jax.random.normal(k1, (N, C, D, H, W), dtype=jnp.float32)
    labels = jax.random.randint(k2, (N, D, H, W), 0, C)
    # one-hot target in NCDHW layout (same shape as y_pred, as the module's math requires)
    y_true = jnp.moveaxis(jax.nn.one_hot(labels, C, dtype=jnp.float32), -1, 1)

    ref = jax.block_until_ready(_reference_loss(y_pred, y_true, BCE_WEIGHTS))

    # Default path: one full-S tile per batch element.
    loss = jax.block_until_ready(combined_loss(y_pred, y_true, BCE_WEIGHTS))
    assert jnp.allclose(loss, ref, rtol=1e-4, atol=1e-5), (loss, ref)

    # Multi-tile + masked-tail path: S=4096 with tile_p=1536 -> tiles 1536/1536/1024.
    loss2 = jax.block_until_ready(
        combined_loss(y_pred, y_true, BCE_WEIGHTS, tile_p=1536))
    assert jnp.allclose(loss2, ref, rtol=1e-4, atol=1e-5), (loss2, ref)

    print("KERNEL_OK")
</pallas_src>

<mosaic_0001>
module attributes {stable_mosaic.version = 11 : i64} {
  func.func @kernel(%arg0: i32, %arg1: i32, %arg2: memref<1x4x4096xf32, #tpu.memory_space<vmem>>, %arg3: memref<1x4x4096xf32, #tpu.memory_space<vmem>>, %arg4: memref<1x4x1xf32, #tpu.memory_space<vmem>>, %arg5: memref<1x1x1xf32, #tpu.memory_space<vmem>>, %arg6: memref<1x1x1xf32, #tpu.memory_space<vmem>>, %arg7: memref<4x4096xf32, #tpu.memory_space<vmem>>, %arg8: memref<4x4096xf32, #tpu.memory_space<vmem>>, %arg9: memref<4x4096xf32, #tpu.memory_space<vmem>>) attributes {dimension_semantics = [#tpu.dimension_semantics<parallel>, #tpu.dimension_semantics<arbitrary>], iteration_bounds = array<i64: 2, 1>, scalar_prefetch = 0 : i64, scratch_operands = 3 : i64, tpu.core_type = #tpu.core_type<tc>, window_params = [{transform_indices = @transform_0, window_bounds = array<i64: 1, 4, 4096>}, {transform_indices = @transform_1, window_bounds = array<i64: 1, 4, 4096>}, {transform_indices = @transform_2, window_bounds = array<i64: 1, 4, 1>}, {transform_indices = @transform_3, window_bounds = array<i64: 1, 1, 1>}, {transform_indices = @transform_4, window_bounds = array<i64: 1, 1, 1>}]} {
    %c0_i32 = arith.constant 0 : i32
    %0 = arith.cmpi eq, %arg1, %c0_i32 : i32
    %1 = arith.extui %0 : i1 to i32
    %c0_i32_0 = arith.constant 0 : i32
    %2 = arith.cmpi ne, %1, %c0_i32_0 : i32
    scf.if %2 {
      %cst_22 = arith.constant 0.000000e+00 : f32
      %37 = vector.broadcast %cst_22 : f32 to vector<4x4096xf32>
      %c0_23 = arith.constant 0 : index
      %c0_24 = arith.constant 0 : index
      %38 = vector.load %arg7[%c0_23, %c0_24] : memref<4x4096xf32, #tpu.memory_space<vmem>>, vector<4x4096xf32>
      tpu.vector_store %arg7[%c0_23, %c0_24], %37 {strides = array<i32>} : memref<4x4096xf32, #tpu.memory_space<vmem>>, vector<4x4096xf32>,
      %cst_25 = arith.constant 0.000000e+00 : f32
      %39 = vector.broadcast %cst_25 : f32 to vector<4x4096xf32>
      %c0_26 = arith.constant 0 : index
      %c0_27 = arith.constant 0 : index
      %40 = vector.load %arg8[%c0_26, %c0_27] : memref<4x4096xf32, #tpu.memory_space<vmem>>, vector<4x4096xf32>
      tpu.vector_store %arg8[%c0_26, %c0_27], %39 {strides = array<i32>} : memref<4x4096xf32, #tpu.memory_space<vmem>>, vector<4x4096xf32>,
      %cst_28 = arith.constant 0.000000e+00 : f32
      %41 = vector.broadcast %cst_28 : f32 to vector<4x4096xf32>
      %c0_29 = arith.constant 0 : index
      %c0_30 = arith.constant 0 : index
      %42 = vector.load %arg9[%c0_29, %c0_30] : memref<4x4096xf32, #tpu.memory_space<vmem>>, vector<4x4096xf32>
      tpu.vector_store %arg9[%c0_29, %c0_30], %41 {strides = array<i32>} : memref<4x4096xf32, #tpu.memory_space<vmem>>, vector<4x4096xf32>,
    } else {
    }
    %c0 = arith.constant 0 : index
    %c0_1 = arith.constant 0 : index
    %c0_2 = arith.constant 0 : index
    %3 = vector.load %arg2[%c0, %c0_1, %c0_2] : memref<1x4x4096xf32, #tpu.memory_space<vmem>>, vector<1x4x4096xf32>
    %4 = vector.shape_cast %3 : vector<1x4x4096xf32> to vector<4x4096xf32>
    %c0_3 = arith.constant 0 : index
    %c0_4 = arith.constant 0 : index
    %c0_5 = arith.constant 0 : index
    %5 = vector.load %arg3[%c0_3, %c0_4, %c0_5] : memref<1x4x4096xf32, #tpu.memory_space<vmem>>, vector<1x4x4096xf32>
    %6 = vector.shape_cast %5 : vector<1x4x4096xf32> to vector<4x4096xf32>
    %cst = arith.constant dense<0xFF800000> : vector<4096xf32>
    %7 = vector.multi_reduction <maximumf>, %4, %cst [0] : vector<4x4096xf32> to vector<4096xf32>
    %8 = vector.shape_cast %7 : vector<4096xf32> to vector<1x4096xf32>
    %9 = vector.broadcast %8 : vector<1x4096xf32> to vector<4x4096xf32>
    %10 = arith.subf %4, %9 : vector<4x4096xf32>
    %11 = math.exp %10 : vector<4x4096xf32>
    %cst_6 = arith.constant dense<0.000000e+00> : vector<4096xf32>
    %12 = vector.multi_reduction <add>, %11, %cst_6 [0] : vector<4x4096xf32> to vector<4096xf32>
    %13 = vector.shape_cast %12 : vector<4096xf32> to vector<1x4096xf32>
    %14 = math.log %13 : vector<1x4096xf32>
    %15 = vector.broadcast %14 : vector<1x4096xf32> to vector<4x4096xf32>
    %16 = arith.subf %15, %10 : vector<4x4096xf32>
    %17 = arith.negf %4 : vector<4x4096xf32>
    %18 = math.exp %17 : vector<4x4096xf32>
    %cst_7 = arith.constant 1.000000e+00 : f32
    %19 = vector.broadcast %cst_7 : f32 to vector<4x4096xf32>
    %20 = arith.addf %19, %18 : vector<4x4096xf32>
    %21 = arith.divf %19, %20 : vector<4x4096xf32>
    %22 = arith.mulf %6, %16 : vector<4x4096xf32>
    %23 = arith.mulf %21, %6 : vector<4x4096xf32>
    %24 = arith.addf %21, %6 : vector<4x4096xf32>
    %c0_8 = arith.constant 0 : index
    %c0_9 = arith.constant 0 : index
    %25 = vector.load %arg7[%c0_8, %c0_9] : memref<4x4096xf32, #tpu.memory_space<vmem>>, vector<4x4096xf32>
    %26 = arith.addf %25, %22 : vector<4x4096xf32>
    %c0_10 = arith.constant 0 : index
    %c0_11 = arith.constant 0 : index
    %27 = vector.load %arg7[%c0_10, %c0_11] : memref<4x4096xf32, #tpu.memory_space<vmem>>, vector<4x4096xf32>
    tpu.vector_store %arg7[%c0_10, %c0_11], %26 {strides = array<i32>} : memref<4x4096xf32, #tpu.memory_space<vmem>>, vector<4x4096xf32>,
    %c0_12 = arith.constant 0 : index
    %c0_13 = arith.constant 0 : index
    %28 = vector.load %arg8[%c0_12, %c0_13] : memref<4x4096xf32, #tpu.memory_space<vmem>>, vector<4x4096xf32>
    %29 = arith.addf %28, %24 : vector<4x4096xf32>
    %c0_14 = arith.constant 0 : index
    %c0_15 = arith.constant 0 : index
    %30 = vector.load %arg8[%c0_14, %c0_15] : memref<4x4096xf32, #tpu.memory_space<vmem>>, vector<4x4096xf32>
    tpu.vector_store %arg8[%c0_14, %c0_15], %29 {strides = array<i32>} : memref<4x4096xf32, #tpu.memory_space<vmem>>, vector<4x4096xf32>,
    %c0_16 = arith.constant 0 : index
    %c0_17 = arith.constant 0 : index
    %31 = vector.load %arg9[%c0_16, %c0_17] : memref<4x4096xf32, #tpu.memory_space<vmem>>, vector<4x4096xf32>
    %32 = arith.addf %31, %23 : vector<4x4096xf32>
    %c0_18 = arith.constant 0 : index
    %c0_19 = arith.constant 0 : index
    %33 = vector.load %arg9[%c0_18, %c0_19] : memref<4x4096xf32, #tpu.memory_space<vmem>>, vector<4x4096xf32>
    tpu.vector_store %arg9[%c0_18, %c0_19], %32 {strides = array<i32>} : memref<4x4096xf32, #tpu.memory_space<vmem>>, vector<4x4096xf32>,
    %c0_i32_20 = arith.constant 0 : i32
    %34 = arith.cmpi eq, %arg1, %c0_i32_20 : i32
    %35 = arith.extui %34 : i1 to i32
    %c0_i32_21 = arith.constant 0 : i32
    %36 = arith.cmpi ne, %35, %c0_i32_21 : i32
    scf.if %36 {
      %c0_22 = arith.constant 0 : index
      %c0_23 = arith.constant 0 : index
      %37 = vector.load %arg7[%c0_22, %c0_23] : memref<4x4096xf32, #tpu.memory_space<vmem>>, vector<4x4096xf32>
      %cst_24 = arith.constant dense<0.000000e+00> : vector<4xf32>
      %38 = vector.multi_reduction <add>, %37, %cst_24 [1] : vector<4x4096xf32> to vector<4xf32>
      %39 = vector.shape_cast %38 : vector<4xf32> to vector<4x1xf32>
      %c0_25 = arith.constant 0 : index
      %c0_26 = arith.constant 0 : index
      %c0_27 = arith.constant 0 : index
      %40 = vector.load %arg4[%c0_25, %c0_26, %c0_27] : memref<1x4x1xf32, #tpu.memory_space<vmem>>, vector<1x4x1xf32>
      %41 = vector.shape_cast %40 : vector<1x4x1xf32> to vector<4x1xf32>
      %42 = vector.shape_cast %39 : vector<4x1xf32> to vector<1x4x1xf32>
      tpu.vector_store %arg4[%c0_25, %c0_26, %c0_27], %42 {strides = array<i32>} : memref<1x4x1xf32, #tpu.memory_space<vmem>>, vector<1x4x1xf32>,
      %c0_28 = arith.constant 0 : index
      %c0_29 = arith.constant 0 : index
      %43 = vector.load %arg8[%c0_28, %c0_29] : memref<4x4096xf32, #tpu.memory_space<vmem>>, vector<4x4096xf32>
      %44 = vector.shape_cast %43 : vector<4x4096xf32> to vector<1x4x4096xf32>
      %cst_30 = arith.constant dense<0.000000e+00> : vector<1xf32>
      %45 = vector.multi_reduction <add>, %44, %cst_30 [1, 2] : vector<1x4x4096xf32> to vector<1xf32>
      %46 = vector.shape_cast %45 : vector<1xf32> to vector<1x1x1xf32>
      %47 = vector.extract %46[0, 0, 0] : f32 from vector<1x1x1xf32>
      %48 = vector.broadcast %47 : f32 to vector<1x1xf32>
      %c0_31 = arith.constant 0 : index
      %c0_32 = arith.constant 0 : index
      %c0_33 = arith.constant 0 : index
      %49 = vector.load %arg5[%c0_31, %c0_32, %c0_33] : memref<1x1x1xf32, #tpu.memory_space<vmem>>, vector<1x1x1xf32>
      %50 = vector.shape_cast %49 : vector<1x1x1xf32> to vector<1x1xf32>
      %51 = vector.shape_cast %48 : vector<1x1xf32> to vector<1x1x1xf32>
      tpu.vector_store %arg5[%c0_31, %c0_32, %c0_33], %51 {strides = array<i32>} : memref<1x1x1xf32, #tpu.memory_space<vmem>>, vector<1x1x1xf32>,
      %c0_34 = arith.constant 0 : index
      %c0_35 = arith.constant 0 : index
      %52 = vector.load %arg9[%c0_34, %c0_35] : memref<4x4096xf32, #tpu.memory_space<vmem>>, vector<4x4096xf32>
      %53 = vector.shape_cast %52 : vector<4x4096xf32> to vector<1x4x4096xf32>
      %cst_36 = arith.constant dense<0.000000e+00> : vector<1xf32>
      %54 = vector.multi_reduction <add>, %53, %cst_36 [1, 2] : vector<1x4x4096xf32> to vector<1xf32>
      %55 = vector.shape_cast %54 : vector<1xf32> to vector<1x1x1xf32>
      %56 = vector.extract %55[0, 0, 0] : f32 from vector<1x1x1xf32>
      %57 = vector.broadcast %56 : f32 to vector<1x1xf32>
      %c0_37 = arith.constant 0 : index
      %c0_38 = arith.constant 0 : index
      %c0_39 = arith.constant 0 : index
      %58 = vector.load %arg6[%c0_37, %c0_38, %c0_39] : memref<1x1x1xf32, #tpu.memory_space<vmem>>, vector<1x1x1xf32>
      %59 = vector.shape_cast %58 : vector<1x1x1xf32> to vector<1x1xf32>
      %60 = vector.shape_cast %57 : vector<1x1xf32> to vector<1x1x1xf32>
      tpu.vector_store %arg6[%c0_37, %c0_38, %c0_39], %60 {strides = array<i32>} : memref<1x1x1xf32, #tpu.memory_space<vmem>>, vector<1x1x1xf32>,
    } else {
    }
    return
  }
  func.func @transform_0(%arg0: i32, %arg1: i32) -> (i32, i32, i32) {
    %c0_i32 = arith.constant 0 : i32
    %c0_i32_0 = arith.constant 0 : i32
    return %arg0, %c0_i32, %arg1 : i32, i32, i32
  }
  func.func @transform_1(%arg0: i32, %arg1: i32) -> (i32, i32, i32) {
    %c0_i32 = arith.constant 0 : i32
    %c0_i32_0 = arith.constant 0 : i32
    return %arg0, %c0_i32, %arg1 : i32, i32, i32
  }
  func.func @transform_2(%arg0: i32, %arg1: i32) -> (i32, i32, i32) {
    %c0_i32 = arith.constant 0 : i32
    %c0_i32_0 = arith.constant 0 : i32
    %c0_i32_1 = arith.constant 0 : i32
    return %arg0, %c0_i32, %c0_i32_0 : i32, i32, i32
  }
  func.func @transform_3(%arg0: i32, %arg1: i32) -> (i32, i32, i32) {
    %c0_i32 = arith.constant 0 : i32
    %c0_i32_0 = arith.constant 0 : i32
    %c0_i32_1 = arith.constant 0 : i32
    return %arg0, %c0_i32, %c0_i32_0 : i32, i32, i32
  }
  func.func @transform_4(%arg0: i32, %arg1: i32) -> (i32, i32, i32) {
    %c0_i32 = arith.constant 0 : i32
    %c0_i32_0 = arith.constant 0 : i32
    %c0_i32_1 = arith.constant 0 : i32
    return %arg0, %c0_i32, %c0_i32_0 : i32, i32, i32
  }
}

</mosaic_0001>

<bundles_post_ra>
// kernel: tpu_custom_call.1
= control target key start
LH: loop header
LB: loop body
LE: loop exit
PB: predicated region body
PF: predicated region fallthrough
CT: control target
= control target key end

     0   :  { %10 = vsyncpa [#allocation6], 0  ;;  %s4809_s0 = inlined_call_operand.hbm [shape: f32[2,4,4096], index: 0, kind: input, shape index: {}]   ;;  %s4810_s1 = inlined_call_operand.hbm [shape: f32[2,4,4096], index: 1, kind: input, shape index: {}]   ;;  %s4811_s2 = inlined_call_operand.vmem [shape: f32[2,4,1], index: 2, kind: output, shape index: {0}]   ;;  %s4812_s3 = inlined_call_operand.vmem [shape: f32[2,1,1], index: 3, kind: output, shape index: {1}]   ;;  %s4813_s4 = inlined_call_operand.vmem [shape: f32[2,1,1], index: 4, kind: output, shape index: {2}]  }
   0x1   :  { %12 = vsyncpa [#allocation6 + $0x1], 0 }
   0x2   :  { %13 = vsyncpa [#allocation8], 0 }
   0x3   :  { %15 = vsyncpa [#allocation8 + $0x1], 0  ;;  %s3040_s15 = smov 0   ;;  %s3042_s16 = smov 0  }
   0x4   :  { %s3044_s17 = smov 0   ;;  %s3046_s18 = smov 0  }
   0x5   :  { %s3048_s19 = smov 0   ;;  %s3050_s20 = smov 0  }
   0x6 LB: > { %s2641_s21 = sadd.s32 4294967295, %s3013_s20   ;;  %s33_s22 = sadd.s32 1, %s3009_s19  ;;  %s3013_s20 = sphi %s3050_s20, %s21_s20   ;;  %s3009_s19 = sphi %s3048_s19, %s5132_s19   ;;  %s3005_s18 = sphi %s3046_s18, %s5131_s18   ;;  %s3001_s17 = sphi %s3044_s17, %s5130_s17   ;;  %s2997_s16 = sphi %s3042_s16, %s5129_s16   ;;  %s2993_s15 = sphi %s3040_s15, %s5128_s15  }
   0x7   : > { %p35_p0 = scmp.ge.s32.totalorder %s33_s22, 2  ;;  %s42_s23 = sadd.s32 1, %s3001_s17 }
   0x8   : > { %p49_p1 = scmp.ne.s32.totalorder %s3001_s17, %s2997_s16  ;;  %p50_p2 = scmp.eq.s32.totalorder %s3013_s20, 0 }
   0x9   : > { %s5134_s22 = smov (%p35_p0, %s33_s22), 0  ;;  %p55_p4 = scmp.ne.s32.totalorder %s2997_s16, %s2993_s15 }
   0xa   : > { %p3076_p3 = por %p50_p2, %p49_p1  ;;  %s37_s25 = ssub.s32 %s3009_s19, %s5134_s22 }
   0xb   : > { %p56_p5 = scmp.eq.s32.totalorder %s2641_s21, 0  ;;  %p40_p6 = scmp.eq.s32.totalorder %s37_s25, 0 }
   0xc   : > { %p2690_p8 = scmp.lt.s32.totalorder %s3013_s20, 2  ;;  %s185_s28 = sand.u32 1, %s3001_s17  }
   0xd   : > { %p3083_p7 = por %p56_p5, %p55_p4  ;;  %s2673_s29 = sshll.u32 %s3009_s19, 7 }
   0xe   : > { %s3089_s27 = scalar_select %p40_p6, %s3001_s17, %s42_s23  }
   0xf   : > { %s2645_s30 = sshll.u32 %s185_s28, 7  ;;  %s196_s7 = scalar_lea.hbm %s4809_s0, %s2673_s29 }
  0x10   : > { %s198_s8 = sshll.u32 %s196_s7, 4  ;;  %s189_s9 = scalar_lea.vmem [#allocation5], %s2645_s30  ;;  %s199_s8 = int_to_ptr.hbm [resolvable:$true] %s198_s8 }
  0x11   : > { %s200_s10 = sshll.u32 %s189_s9, 4  ;;  %p2684_p9 = pnand %p2690_p8, %p3076_p3  ;;  %s201_s10 = int_to_ptr.vmem [resolvable:$true] %s200_s10 }
  0x12   : > { %p2651_p10 = scmp.ge.s32.totalorder %s3013_s20, 1  ;;  %p227_p11 = scmp.lt.s32.totalorder %s3013_s20, 3 }
  0x13   : > { %s186_s11 = scalar_lea.sflag [#allocation6], %s185_s28  ;;  %s218_s14 = scalar_lea.hbm %s4810_s1, %s2673_s29 }
  0x14   : > { %2686 = dma.hbm_to_vmem [thread:$0]  (!%p2684_p9), %s199_s8, 2048, %s201_s10, %s186_s11  }
  0x15   : > { %p228_p12 = pnand %p2651_p10, %p227_p11  ;;  %s220_s15 = sshll.u32 %s218_s14, 4  ;;  %s221_s15 = int_to_ptr.hbm [resolvable:$true] %s220_s15 }
  0x16   : > { %s211_s21 = scalar_lea.vmem [#allocation7], %s2645_s30  ;;  %s208_s25 = scalar_lea.sflag [#allocation8], %s185_s28 }
  0x17   : > { %s222_s23 = sshll.u32 %s211_s21, 4  ;;  %231 = sbr.rel (%p228_p12) target bundleno = 643 (0x283), region = 28  ;;  %s223_s23 = int_to_ptr.vmem [resolvable:$true] %s222_s23 }
  0x18   : > { %2689 = dma.hbm_to_vmem [thread:$0]  (!%p2684_p9), %s221_s15, 2048, %s223_s23, %s208_s25  }
  0x1c   : > { %s233_s24 = sand.u32 1, %s2997_s16  }
  0x1d   : > { %s2652_s5 = sshll.u32 %s233_s24, 7  ;;  %s234_s6 = scalar_lea.sflag [#allocation6], %s233_s24 }
  0x1e   : > { %s3104_s7 = scalar_lea.vmem [#allocation5], %s2652_s5 }
  0x1f   : > { %2984 = dma.done.wait (%p3083_p7), %s234_s6, 2048  }
  0x20   : > { %2986 = vsyncadd (%p3083_p7), %s234_s6, 4294965248  ;;  %s244_s29 = scalar_lea.sflag [#allocation8], %s233_s24  ;;  %s3110_s30 = scalar_lea.vmem [#allocation7], %s2652_s5 }
  0x21   : > { %2988 = dma.done.wait (%p3083_p7), %s244_s29, 2048  }
  0x22   : > { %2990 = vsyncadd (%p3083_p7), %s244_s29, 4294965248  ;;  %v3117_v0 = vld [vmem:[%s3104_s7] sm:$0xff]  ;;  %v3120_v1 = vld [vmem:[%s3104_s7 + $0x8] sm:$0xff]  ;;  %vm478_vm0 = vcmask 1043456   ;;  %p285_p13 = scmp.lt.s32.totalorder %s3005_s18, 1 }
  0x23   : > { %4869 = vst [vmem:[#allocation11_spill] sm:$0xff] %v3117_v0  ;;  %v3123_v2 = vld [vmem:[%s3104_s7 + $0x10] sm:$0xff]  ;;  %v3126_v3 = vld [vmem:[%s3104_s7 + $0x18] sm:$0xff]  ;;  %v3133_v4 = vld [vmem:[%s3104_s7 + $0x20] sm:$0xff] }
  0x24   : > { %4870 = vst [vmem:[#allocation12_spill] sm:$0xff] %v3120_v1  ;;  %v3136_v5 = vld [vmem:[%s3104_s7 + $0x28] sm:$0xff]  ;;  %v3139_v7 = vld [vmem:[%s3104_s7 + $0x30] sm:$0xff]  ;;  %v3142_v14 = vld [vmem:[%s3104_s7 + $0x38] sm:$0xff]  ;;  %s5136_s18 = smov (!%p285_p13, %s3005_s18), 1 }
  0x25   : > { %4871 = vst [vmem:[#allocation13_spill] sm:$0xff] %v3123_v2  ;;  %v3149_v16 = vld [vmem:[%s3104_s7 + $0x40] sm:$0xff]  ;;  %v3152_v17 = vld [vmem:[%s3104_s7 + $0x48] sm:$0xff]  ;;  %v3157_v19 = vld [vmem:[%s3104_s7 + $0x50] sm:$0xff]  ;;  %s291_s8 = scalar_lea.vmem %s4812_s3, %s5136_s18  ;;  %s2654_s10 = sshll.u32 %s5136_s18, 2 }
  0x26   : > { %4872 = vst [vmem:[#allocation14_spill] sm:$0xff] %v3126_v3  ;;  %v3172_v26 = vld [vmem:[%s3104_s7 + $0x58] sm:$0xff]  ;;  %v3187_v36 = vld [vmem:[%s3104_s7 + $0x60] sm:$0xff]  ;;  %v3190_v39 = vld [vmem:[%s3104_s7 + $0x68] sm:$0xff]  ;;  %s288_s13 = scalar_lea.vmem %s4811_s2, %s2654_s10  ;;  %s294_s21 = scalar_lea.vmem %s4813_s4, %s5136_s18 }
  0x27   : > { %395 = vst [vmem:[#allocation1] ss:$2 sm:$0xff] %v3117_v0  ;;  %v3196_v44 = vld [vmem:[%s3104_s7 + $0x70] sm:$0xff]  ;;  %v3203_v47 = vld [vmem:[%s3104_s7 + $0x78] sm:$0xff] }
  0x28   : > { %397 = vst [vmem:[#allocation1 + $0x10] ss:$2 sm:$0xff] %v3120_v1 }
  0x29   : > { %399 = vst [vmem:[#allocation1 + $0x20] ss:$2 sm:$0xff] %v3123_v2 }
  0x2a   : > { %401 = vst [vmem:[#allocation1 + $0x30] ss:$2 sm:$0xff] %v3126_v3 }
  0x2b   : > { %4873 = vst [vmem:[#allocation15_spill] sm:$0xff] %v3133_v4 }
  0x2c   : > { %4874 = vst [vmem:[#allocation16_spill] sm:$0xff] %v3136_v5 }
  0x2d   : > { %4875 = vst [vmem:[#allocation17_spill] sm:$0xff] %v3139_v7 }
  0x2e   : > { %v402_v6 = vld.sshfl [vmem:[#allocation1] sm:$0xff pattern:$0x75316420]  ;;  %v403_v8 = vld.sshfl [vmem:[#allocation1 + $0x8] sm:$0xff pattern:$0x75316420] }
  0x2f   : > { %v404_v9 = vld.sshfl [vmem:[#allocation1 + $0x10] sm:$0xff pattern:$0x75316420]  ;;  %v405_v10 = vld.sshfl [vmem:[#allocation1 + $0x18] sm:$0xff pattern:$0x75316420] }
  0x30   : > { %v406_v11 = vld.sshfl [vmem:[#allocation1 + $0x20] sm:$0xff pattern:$0x75316420]  ;;  %v407_v12 = vld.sshfl [vmem:[#allocation1 + $0x28] sm:$0xff pattern:$0x75316420] }
  0x31   : > { %v408_v13 = vld.sshfl [vmem:[#allocation1 + $0x30] sm:$0xff pattern:$0x75316420]  ;;  %4876 = vst [vmem:[#allocation18_spill] sm:$0xff] %v3142_v14  ;;  %v479_v28 = vsel %vm478_vm0, %v402_v6, -inf  ;;  %v486_v29 = vsel %vm478_vm0, %v403_v8, -inf }
  0x32   : > { %v409_v15 = vld.sshfl [vmem:[#allocation1 + $0x38] sm:$0xff pattern:$0x75316420]  ;;  %410 = vst [vmem:[#allocation1] ss:$2 sm:$0xff] %v3133_v4  ;;  %v493_v30 = vsel %vm478_vm0, %v404_v9, -inf }
  0x33   : > { %411 = vst [vmem:[#allocation1 + $0x10] ss:$2 sm:$0xff] %v3136_v5  ;;  %v500_v31 = vsel %vm478_vm0, %v405_v10, -inf  ;;  %v507_v32 = vsel %vm478_vm0, %v406_v11, -inf  ;;  %v514_v33 = vsel %vm478_vm0, %v407_v12, -inf  ;;  %v480_v34 = vrot.slane %v479_v28, 4 }
  0x34   : > { %412 = vst [vmem:[#allocation1 + $0x20] ss:$2 sm:$0xff] %v3139_v7  ;;  %v487_v35 = vrot.slane %v486_v29, 4  ;;  %v494_v37 = vrot.slane %v493_v30, 4  ;;  %v501_v38 = vrot.slane %v500_v31, 4  ;;  %v508_v41 = vrot.slane %v507_v32, 4 }
  0x35   : > { %413 = vst [vmem:[#allocation1 + $0x30] ss:$2 sm:$0xff] %v3142_v14  ;;  %v515_v42 = vrot.slane %v514_v33, 4  ;;  %v521_v43 = vsel %vm478_vm0, %v408_v13, -inf  ;;  %v481_v50 = vmax.f32 %v479_v28, %v480_v34  ;;  %v528_v56 = vsel %vm478_vm0, %v409_v15, -inf }
  0x36   : > { %4877 = vst [vmem:[#allocation19_spill] sm:$0xff] %v3149_v16  ;;  %v488_v51 = vmax.f32 %v486_v29, %v487_v35  ;;  %v495_v54 = vmax.f32 %v493_v30, %v494_v37  ;;  %v502_v57 = vmax.f32 %v500_v31, %v501_v38  ;;  %v522_v58 = vrot.slane %v521_v43, 4 }
  0x37   : > { %4878 = vst [vmem:[#allocation20_spill] sm:$0xff] %v3152_v17  ;;  %v482_v59 = vrot.slane %v481_v50, 2  ;;  %v529_v62 = vrot.slane %v528_v56, 4  ;;  %v509_v63 = vmax.f32 %v507_v32, %v508_v41  ;;  %v516_v6 = vmax.f32 %v514_v33, %v515_v42 }
  0x38   : > { %4879 = vst [vmem:[#allocation21_spill] sm:$0xff] %v3157_v19  ;;  %v489_v60 = vrot.slane %v488_v51, 2  ;;  %v496_v61 = vrot.slane %v495_v54, 2  ;;  %v503_v8 = vrot.slane %v502_v57, 2  ;;  %v523_v9 = vmax.f32 %v521_v43, %v522_v58 }
  0x39   : > { %v3154_v18 = vld.sshfl [vmem:[#allocation1] sm:$0xff pattern:$0x75316420]  ;;  %v3159_v20 = vld.sshfl [vmem:[#allocation1 + $0x8] sm:$0xff pattern:$0x75316420]  ;;  %v483_v10 = vmax.f32 %v481_v50, %v482_v59  ;;  %v530_v13 = vmax.f32 %v528_v56, %v529_v62 }
  0x3a   : > { %v3161_v21 = vld.sshfl [vmem:[#allocation1 + $0x10] sm:$0xff pattern:$0x75316420]  ;;  %v3163_v22 = vld.sshfl [vmem:[#allocation1 + $0x18] sm:$0xff pattern:$0x75316420]  ;;  %v490_v11 = vmax.f32 %v488_v51, %v489_v60  ;;  %v497_v12 = vmax.f32 %v495_v54, %v496_v61  ;;  %v504_v29 = vmax.f32 %v502_v57, %v503_v8 }
  0x3b   : > { %v3165_v23 = vld.sshfl [vmem:[#allocation1 + $0x20] sm:$0xff pattern:$0x75316420]  ;;  %v3167_v24 = vld.sshfl [vmem:[#allocation1 + $0x28] sm:$0xff pattern:$0x75316420] }
  0x3c   : > { %v3169_v25 = vld.sshfl [vmem:[#allocation1 + $0x30] sm:$0xff pattern:$0x75316420]  ;;  %4880 = vst [vmem:[#allocation22_spill] sm:$0xff] %v3172_v26  ;;  %v510_v15 = vrot.slane %v509_v63, 2  ;;  %v517_v28 = vrot.slane %v516_v6, 2 }
  0x3d   : > { %v3174_v27 = vld.sshfl [vmem:[#allocation1 + $0x38] sm:$0xff pattern:$0x75316420]  ;;  %422 = vst [vmem:[#allocation1] ss:$2 sm:$0xff] %v3149_v16  ;;  %v524_v30 = vrot.slane %v523_v9, 2 }
  0x3e   : > { %423 = vst [vmem:[#allocation1 + $0x10] ss:$2 sm:$0xff] %v3152_v17  ;;  %v484_v31 = vrot.slane %v483_v10, 1  ;;  %v491_v34 = vrot.slane %v490_v11, 1  ;;  %v535_v35 = vsel %vm478_vm0, %v3154_v18, -inf  ;;  %v542_v37 = vsel %vm478_vm0, %v3159_v20, -inf }
  0x3f   : > { %424 = vst [vmem:[#allocation1 + $0x20] ss:$2 sm:$0xff] %v3157_v19  ;;  %v498_v32 = vrot.slane %v497_v12, 1  ;;  %v531_v33 = vrot.slane %v530_v13, 2  ;;  %v549_v38 = vsel %vm478_vm0, %v3161_v21, -inf  ;;  %v511_v41 = vmax.f32 %v509_v63, %v510_v15 }
  0x40   : > { %425 = vst [vmem:[#allocation1 + $0x30] ss:$2 sm:$0xff] %v3172_v26  ;;  %v518_v42 = vmax.f32 %v516_v6, %v517_v28  ;;  %v556_v43 = vsel %vm478_vm0, %v3163_v22, -inf  ;;  %v525_v50 = vmax.f32 %v523_v9, %v524_v30  ;;  %v536_v51 = vrot.slane %v535_v35, 4 }
  0x41   : > { %4881 = vst [vmem:[#allocation23_spill] sm:$0xff] %v3187_v36  ;;  %v543_v54 = vrot.slane %v542_v37, 4  ;;  %v563_v56 = vsel %vm478_vm0, %v3165_v23, -inf  ;;  %v3230_v18 = vmax.f32 %v483_v10, %v484_v31  ;;  %v3232_v57 = vmax.f32 %v490_v11, %v491_v34 }
  0x42   : > { %4882 = vst [vmem:[#allocation24_spill] sm:$0xff] %v3190_v39  ;;  %v505_v20 = vrot.slane %v504_v29, 1  ;;  %v550_v58 = vrot.slane %v549_v38, 4  ;;  %v3234_v59 = vmax.f32 %v497_v12, %v498_v32  ;;  %v532_v21 = vmax.f32 %v530_v13, %v531_v33 }
  0x43   : > { %4883 = vst [vmem:[#allocation25_spill] sm:$0xff] %v3196_v44  ;;  %v557_v60 = vrot.slane %v556_v43, 4  ;;  %v570_v61 = vsel %vm478_vm0, %v3167_v24, -inf  ;;  %v512_v22 = vrot.slane %v511_v41, 1  ;;  %v519_v62 = vrot.slane %v518_v42, 1 }
  0x44   : > { %v3192_v40 = vld.sshfl [vmem:[#allocation1] sm:$0xff pattern:$0x75316420]  ;;  %v3198_v45 = vld.sshfl [vmem:[#allocation1 + $0x8] sm:$0xff pattern:$0x75316420]  ;;  %v537_v8 = vmax.f32 %v535_v35, %v536_v51  ;;  %v544_v9 = vmax.f32 %v542_v37, %v543_v54  ;;  %v3242_v11 = vmax.f32 %v504_v29, %v505_v20  ;;  %v551_v12 = vmax.f32 %v549_v38, %v550_v58 }
  0x45   : > { %v3200_v46 = vld.sshfl [vmem:[#allocation1 + $0x10] sm:$0xff pattern:$0x75316420]  ;;  %4884 = vst [vmem:[#allocation26_spill] sm:$0xff] %v3203_v47  ;;  %v564_v63 = vrot.slane %v563_v56, 4  ;;  %v577_v6 = vsel %vm478_vm0, %v3169_v25, -inf  ;;  %v558_v28 = vmax.f32 %v556_v43, %v557_v60  ;;  %v3248_v25 = vmax.f32 %v511_v41, %v512_v22 }
  0x46   : > { %v3205_v48 = vld.sshfl [vmem:[#allocation1 + $0x18] sm:$0xff pattern:$0x75316420]  ;;  %v3207_v49 = vld.sshfl [vmem:[#allocation1 + $0x20] sm:$0xff pattern:$0x75316420]  ;;  %v3250_v34 = vmax.f32 %v518_v42, %v519_v62 }
  0x47   : > { %v3209_v52 = vld.sshfl [vmem:[#allocation1 + $0x28] sm:$0xff pattern:$0x75316420]  ;;  %v3211_v53 = vld.sshfl [vmem:[#allocation1 + $0x30] sm:$0xff pattern:$0x75316420]  ;;  %v565_v35 = vmax.f32 %v563_v56, %v564_v63 }
  0x48   : > { %v3213_v55 = vld.sshfl [vmem:[#allocation1 + $0x38] sm:$0xff pattern:$0x75316420]  ;;  %434 = vst [vmem:[#allocation1] ss:$2 sm:$0xff] %v3187_v36  ;;  %v526_v23 = vrot.slane %v525_v50, 1 }
  0x49   : > { %435 = vst [vmem:[#allocation1 + $0x10] ss:$2 sm:$0xff] %v3190_v39  ;;  %v584_v10 = vsel %vm478_vm0, %v3174_v27, -inf  ;;  %v571_v13 = vrot.slane %v570_v61, 4  ;;  %v591_v15 = vsel %vm478_vm0, %v3192_v40, -inf  ;;  %v533_v24 = vrot.slane %v532_v21, 1 }
  0x4a   : > { %436 = vst [vmem:[#allocation1 + $0x20] ss:$2 sm:$0xff] %v3196_v44  ;;  %v578_v30 = vrot.slane %v577_v6, 4  ;;  %v598_v31 = vsel %vm478_vm0, %v3198_v45, -inf  ;;  %v585_v37 = vrot.slane %v584_v10, 4  ;;  %v3252_v27 = vmax.f32 %v525_v50, %v526_v23 }
  0x4b   : > { %437 = vst [vmem:[#allocation1 + $0x30] ss:$2 sm:$0xff] %v3203_v47  ;;  %v538_v29 = vrot.slane %v537_v8, 2  ;;  %v545_v32 = vrot.slane %v544_v9, 2  ;;  %v592_v33 = vrot.slane %v591_v15, 4  ;;  %v572_v38 = vmax.f32 %v570_v61, %v571_v13 }
  0x4c   : > { %v599_v51 = vrot.slane %v598_v31, 4  ;;  %v605_v40 = vsel %vm478_vm0, %v3200_v46, -inf  ;;  %v612_v43 = vsel %vm478_vm0, %v3205_v48, -inf  ;;  %v3258_v45 = vmax.f32 %v532_v21, %v533_v24 }
  0x4d   : > { %v552_v41 = vrot.slane %v551_v12, 2  ;;  %v559_v42 = vrot.slane %v558_v28, 2  ;;  %v579_v54 = vmax.f32 %v577_v6, %v578_v30  ;;  %v566_v56 = vrot.slane %v565_v35, 2 }
  0x4e   : > { %v586_v20 = vmax.f32 %v584_v10, %v585_v37  ;;  %v619_v50 = vsel %vm478_vm0, %v3207_v49, -inf  ;;  %v626_v58 = vsel %vm478_vm0, %v3209_v52, -inf  ;;  %v593_v60 = vmax.f32 %v591_v15, %v592_v33 }
  0x4f   : > { %v606_v61 = vrot.slane %v605_v40, 4  ;;  %v613_v22 = vrot.slane %v612_v43, 4  ;;  %v633_v46 = vsel %vm478_vm0, %v3211_v53, -inf  ;;  %v539_v48 = vmax.f32 %v537_v8, %v538_v29 }
  0x50   : > { %v546_v21 = vmax.f32 %v544_v9, %v545_v32  ;;  %v573_v62 = vrot.slane %v572_v38, 2  ;;  %v600_v63 = vmax.f32 %v598_v31, %v599_v51  ;;  %v553_v23 = vmax.f32 %v551_v12, %v552_v41 }
  0x51   : > { %v620_v6 = vrot.slane %v619_v50, 4  ;;  %v627_v13 = vrot.slane %v626_v58, 4  ;;  %v640_v10 = vsel %vm478_vm0, %v3213_v55, -inf  ;;  %v560_v49 = vmax.f32 %v558_v28, %v559_v42 }
  0x52   : > { %v580_v24 = vrot.slane %v579_v54, 2  ;;  %v587_v30 = vrot.slane %v586_v20, 2  ;;  %v634_v52 = vrot.slane %v633_v46, 4  ;;  %v567_v15 = vmax.f32 %v565_v35, %v566_v56  ;;  %v438_v35 = vld.sshfl [vmem:[#allocation1] sm:$0xff pattern:$0x75316420] }
  0x53   : > { %v594_v37 = vrot.slane %v593_v60, 2  ;;  %v607_v33 = vmax.f32 %v605_v40, %v606_v61  ;;  %v614_v47 = vmax.f32 %v612_v43, %v613_v22  ;;  %v540_v44 = vrot.slane %v539_v48, 1  ;;  %v439_v61 = vld.sshfl [vmem:[#allocation1 + $0x8] sm:$0xff pattern:$0x75316420] }
  0x54   : > { %v574_v53 = vmax.f32 %v572_v38, %v573_v62  ;;  %v601_v8 = vrot.slane %v600_v63, 2  ;;  %v641_v9 = vrot.slane %v640_v10, 4  ;;  %v547_v29 = vrot.slane %v546_v21, 1 }
  0x55   : > { %v554_v31 = vrot.slane %v553_v23, 1  ;;  %v621_v12 = vmax.f32 %v619_v50, %v620_v6  ;;  %v628_v32 = vmax.f32 %v626_v58, %v627_v13  ;;  %v561_v51 = vrot.slane %v560_v49, 1  ;;  %v441_v13 = vld.sshfl [vmem:[#allocation1 + $0x18] sm:$0xff pattern:$0x75316420] }
  0x56   : > { %v581_v41 = vmax.f32 %v579_v54, %v580_v24  ;;  %v588_v39 = vmax.f32 %v586_v20, %v587_v30  ;;  %v635_v55 = vmax.f32 %v633_v46, %v634_v52  ;;  %v568_v28 = vrot.slane %v567_v15, 1  ;;  %v440_v54 = vld.sshfl [vmem:[#allocation1 + $0x10] sm:$0xff pattern:$0x75316420] }
  0x57   : > { %v595_v42 = vmax.f32 %v593_v60, %v594_v37  ;;  %v608_v36 = vrot.slane %v607_v33, 2  ;;  %v615_v26 = vrot.slane %v614_v47, 2  ;;  %v3268_v56 = vmax.f32 %v539_v48, %v540_v44 }
  0x58   : > { %v575_v40 = vrot.slane %v574_v53, 1  ;;  %v602_v43 = vmax.f32 %v600_v63, %v601_v8  ;;  %v642_v38 = vmax.f32 %v640_v10, %v641_v9  ;;  %v3270_v22 = vmax.f32 %v546_v21, %v547_v29  ;;  %v443_v9 = vld.sshfl [vmem:[#allocation1 + $0x28] sm:$0xff pattern:$0x75316420] }
  0x59   : > { %v3272_v62 = vmax.f32 %v553_v23, %v554_v31  ;;  %v622_v50 = vrot.slane %v621_v12, 2  ;;  %v629_v58 = vrot.slane %v628_v32, 2  ;;  %v3274_v20 = vmax.f32 %v560_v49, %v561_v51  ;;  %v442_v51 = vld.sshfl [vmem:[#allocation1 + $0x20] sm:$0xff pattern:$0x75316420] }
  0x5a   : > { %v582_v46 = vrot.slane %v581_v41, 1  ;;  %v589_v60 = vrot.slane %v588_v39, 1  ;;  %v636_v6 = vrot.slane %v635_v55, 2  ;;  %v3276_v24 = vmax.f32 %v567_v15, %v568_v28 }
  0x5b   : > { %v596_v44 = vrot.slane %v595_v42, 1  ;;  %v609_v48 = vmax.f32 %v607_v33, %v608_v36  ;;  %v616_v63 = vmax.f32 %v614_v47, %v615_v26  ;;  %v3278_v10 = vmax.f32 %v574_v53, %v575_v40 }
  0x5c   : > { %v603_v21 = vrot.slane %v602_v43, 1  ;;  %v643_v30 = vrot.slane %v642_v38, 2  ;;  %v647_v23 = vsel %vm478_vm0, %v438_v35, -inf  ;;  %v623_v52 = vmax.f32 %v621_v12, %v622_v50 }
  0x5d   : > { %v630_v37 = vmax.f32 %v628_v32, %v629_v58  ;;  %v654_v49 = vsel %vm478_vm0, %v439_v61, -inf  ;;  %v661_v8 = vsel %vm478_vm0, %v440_v54, -inf  ;;  %v3283_v29 = vmax.f32 %v581_v41, %v582_v46 }
  0x5e   : > { %v3285_v15 = vmax.f32 %v588_v39, %v589_v60  ;;  %v637_v31 = vmax.f32 %v635_v55, %v636_v6  ;;  %v668_v26 = vsel %vm478_vm0, %v441_v13, -inf  ;;  %v3288_v36 = vmax.f32 %v595_v42, %v596_v44  ;;  %v445_v60 = vld.sshfl [vmem:[#allocation1 + $0x38] sm:$0xff pattern:$0x75316420] }
  0x5f   : > { %v610_v47 = vrot.slane %v609_v48, 1  ;;  %v617_v33 = vrot.slane %v616_v63, 1  ;;  %v648_v53 = vrot.slane %v647_v23, 4  ;;  %v3290_v12 = vmax.f32 %v602_v43, %v603_v21 }
  0x60   : > { %v3292_v32 = vmax.f32 %v642_v38, %v643_v30  ;;  %v655_v28 = vrot.slane %v654_v49, 4  ;;  %v662_v35 = vrot.slane %v661_v8, 4  ;;  %v624_v40 = vrot.slane %v623_v52, 1  ;;  %v444_v30 = vld.sshfl [vmem:[#allocation1 + $0x30] sm:$0xff pattern:$0x75316420] }
  0x61   : > { %v631_v41 = vrot.slane %v630_v37, 1  ;;  %v669_v61 = vrot.slane %v668_v26, 4  ;;  %v682_v39 = vsel %vm478_vm0, %v443_v9, -inf  ;;  %v638_v55 = vrot.slane %v637_v31, 1 }
  0x62   : > { %v735_v50 = vrot.slane %v3232_v57, 4  ;;  %v736_v42 = vrot.slane %v3242_v11, 4  ;;  %v737_v58 = vrot.slane %v3250_v34, 4  ;;  %v3298_v54 = vmax.f32 %v609_v48, %v610_v47 }
  0x63   : > { %v3300_v43 = vmax.f32 %v616_v63, %v617_v33  ;;  %v649_v38 = vmax.f32 %v647_v23, %v648_v53  ;;  %v738_v46 = vrot.slane %v3258_v45, 4  ;;  %v656_v6 = vmax.f32 %v654_v49, %v655_v28 }
  0x64   : > { %v663_v13 = vmax.f32 %v661_v8, %v662_v35  ;;  %v675_v44 = vsel %vm478_vm0, %v442_v51, -inf  ;;  %v683_v21 = vrot.slane %v682_v39, 4  ;;  %v3304_v9 = vmax.f32 %v623_v52, %v624_v40 }
  0x65   : > { %v3306_v57 = vmax.f32 %v630_v37, %v631_v41  ;;  %v645_v11 = vrot.slane %v3292_v32, 1  ;;  %v670_v34 = vmax.f32 %v668_v26, %v669_v61  ;;  %v3309_v48 = vmax.f32 %v637_v31, %v638_v55 }
  0x66   : > { %v751_v63 = vsel %vm478_vm0, %v3230_v18, %v735_v50  ;;  %v752_v45 = vsel %vm478_vm0, %v3234_v59, %v736_v42  ;;  %v753_v23 = vsel %vm478_vm0, %v3248_v25, %v737_v58  ;;  %v650_v49 = vrot.slane %v649_v38, 2 }
  0x67   : > { %v676_v8 = vrot.slane %v675_v44, 4  ;;  %v696_v52 = vsel %vm478_vm0, %v445_v60, -inf  ;;  %v754_v37 = vsel %vm478_vm0, %v3252_v27, %v738_v46  ;;  %v657_v47 = vrot.slane %v656_v6, 2 }
  0x68   : > { %v664_v26 = vrot.slane %v663_v13, 2  ;;  %v684_v31 = vmax.f32 %v682_v39, %v683_v21  ;;  %v689_v33 = vsel %vm478_vm0, %v444_v30, -inf  ;;  %v739_v18 = vrot.slane %v3270_v22, 4 }
  0x69   : > { %v3323_v53 = vsub.f32 %v3117_v0, %v751_v63  ;;  %v3326_v59 = vsub.f32 %v3120_v1, %v752_v45  ;;  %v3329_v25 = vsub.f32 %v3123_v2, %v753_v23  ;;  %v671_v51 = vrot.slane %v670_v34, 2 }
  0x6a   : > { %v697_v28 = vrot.slane %v696_v52, 4  ;;  %v740_v27 = vrot.slane %v3274_v20, 4  ;;  %v3333_v35 = vsub.f32 %v3126_v3, %v754_v37  ;;  %v3335_v40 = vmax.f32 %v649_v38, %v650_v49 }
  0x6b   : > { %v677_v41 = vmax.f32 %v675_v44, %v676_v8  ;;  %v690_v22 = vrot.slane %v689_v33, 4  ;;  %v741_v61 = vrot.slane %v3278_v10, 4  ;;  %v658_v39 = vmax.f32 %v656_v6, %v657_v47 }
  0x6c   : > { %v3338_v55 = vmax.f32 %v663_v13, %v664_v26  ;;  %v685_v50 = vrot.slane %v684_v31, 2  ;;  %v742_v42 = vrot.slane %v3285_v15, 4  ;;  %v755_v58 = vsel %vm478_vm0, %v3268_v56, %v739_v18 }
  0x6d   : > { %v799_v20 = vmul.f32 1.442695, %v3323_v53  ;;  %v801_v46 = vmul.f32 1.442695, %v3326_v59  ;;  %v803_v38 = vmul.f32 1.442695, %v3329_v25  ;;  %v672_v60 = vmax.f32 %v670_v34, %v671_v51 }
  0x6e   : > { %v698_v44 = vmax.f32 %v696_v52, %v697_v28  ;;  %v756_v10 = vsel %vm478_vm0, %v3272_v62, %v740_v27  ;;  %v805_v6 = vmul.f32 1.442695, %v3333_v35  ;;  %v678_v13 = vrot.slane %v677_v41, 2 }
  0x6f   : > { %v691_v21 = vmax.f32 %v689_v33, %v690_v22  ;;  %v757_v15 = vsel %vm478_vm0, %v3276_v24, %v741_v61  ;;  %2739 = vpow2.f32 %v799_v20  ;;  %v686_v56 = vmax.f32 %v684_v31, %v685_v50 }
  0x70   : > { %v758_v30 = vsel %vm478_vm0, %v3283_v29, %v742_v42  ;;  %v3354_v63 = vsub.f32 %v3133_v4, %v755_v58  ;;  %2741 = vpow2.f32 %v801_v46  ;;  %v743_v34 = vrot.slane %v3290_v12, 4 }
  0x71   : > { %v744_v62 = vrot.slane %v3300_v43, 4  ;;  %v3359_v45 = vsub.f32 %v3136_v5, %v756_v10  ;;  %2743 = vpow2.f32 %v803_v38  ;;  %v699_v23 = vrot.slane %v698_v44, 2 }
  0x72   : > { %v745_v24 = vrot.slane %v3306_v57, 4  ;;  %v3363_v49 = vsub.f32 %v3139_v7, %v757_v15  ;;  %2745 = vpow2.f32 %v805_v6  ;;  %v646_v29 = vmax.f32 %v3292_v32, %v645_v11 }
  0x73   : > { %v659_v8 = vrot.slane %v658_v39, 1  ;;  %v692_v52 = vrot.slane %v691_v21, 2  ;;  %v3367_v37 = vsub.f32 %v3142_v14, %v758_v30  ;;  %v652_v12 = vrot.slane %v3335_v40, 1 }
  0x74   : > { %v673_v43 = vrot.slane %v672_v60, 1  ;;  %v679_v47 = vmax.f32 %v677_v41, %v678_v13  ;;  %v807_v26 = vmul.f32 1.442695, %v3354_v63  ;;  %v687_v33 = vrot.slane %v686_v56, 1 }
  0x75   : > { %v2740_v31 = vpop.eup %2739  ;;  %v759_v57 = vsel %vm478_vm0, %v3288_v36, %v743_v34  ;;  %v760_v18 = vsel %vm478_vm0, %v3298_v54, %v744_v62  ;;  %v809_v32 = vmul.f32 1.442695, %v3359_v45  ;;  %v666_v51 = vrot.slane %v3338_v55, 1 }
  0x76   : > { %v2742_v11 = vpop.eup %2741  ;;  %v700_v28 = vmax.f32 %v698_v44, %v699_v23  ;;  %v761_v27 = vsel %vm478_vm0, %v3304_v9, %v745_v24  ;;  %v811_v41 = vmul.f32 1.442695, %v3363_v49  ;;  %847 = vst [vmem:[#allocation1] ss:$2 sm:$0xff] %v2740_v31  ;;  %v660_v61 = vmax.f32 %v658_v39, %v659_v8 }
  0x77   : > { %v2744_v22 = vpop.eup %2743  ;;  %v693_v50 = vmax.f32 %v691_v21, %v692_v52  ;;  %v746_v42 = vrot.slane %v646_v29, 4  ;;  %v813_v36 = vmul.f32 1.442695, %v3367_v37  ;;  %849 = vst [vmem:[#allocation1 + $0x10] ss:$2 sm:$0xff] %v2742_v11  ;;  %v674_v58 = vmax.f32 %v672_v60, %v673_v43 }
  0x78   : > { %v2746_v54 = vpop.eup %2745  ;;  %v3382_v20 = vsub.f32 %v3149_v16, %v759_v57  ;;  %v3385_v46 = vsub.f32 %v3152_v17, %v760_v18  ;;  %2747 = vpow2.f32 %v807_v26  ;;  %851 = vst [vmem:[#allocation1 + $0x20] ss:$2 sm:$0xff] %v2744_v22  ;;  %v680_v9 = vrot.slane %v679_v47, 1  ;;  %v4886_v22 = vld [vmem:[#allocation23_spill] sm:$0xff] }
  0x79   : > { %v688_v38 = vmax.f32 %v686_v56, %v687_v33  ;;  %v3388_v44 = vsub.f32 %v3157_v19, %v761_v27  ;;  %2749 = vpow2.f32 %v809_v32  ;;  %853 = vst [vmem:[#allocation1 + $0x30] ss:$2 sm:$0xff] %v2746_v54  ;;  %v653_v39 = vmax.f32 %v3335_v40, %v652_v12  ;;  %v4888_v54 = vld [vmem:[#allocation25_spill] sm:$0xff] }
  0x7a   : > { %v701_v10 = vrot.slane %v700_v28, 1  ;;  %2751 = vpow2.f32 %v811_v41  ;;  %v667_v60 = vmax.f32 %v3338_v55, %v666_v51  ;;  %v694_v6 = vrot.slane %v693_v50, 1  ;;  %v4885_v55 = vld [vmem:[#allocation22_spill] sm:$0xff] }
  0x7b   : > { %v762_v13 = vsel %vm478_vm0, %v3309_v48, %v746_v42  ;;  %2753 = vpow2.f32 %v813_v36  ;;  %v747_v21 = vrot.slane %v660_v61, 4  ;;  %v748_v15 = vrot.slane %v674_v58, 4  ;;  %v4887_v42 = vld [vmem:[#allocation24_spill] sm:$0xff] }
  0x7c   : > { %v815_v56 = vmul.f32 1.442695, %v3382_v20  ;;  %v817_v30 = vmul.f32 1.442695, %v3385_v46  ;;  %v681_v34 = vmax.f32 %v679_v47, %v680_v9  ;;  %v749_v62 = vrot.slane %v688_v38, 4 }
  0x7d   : > { %v819_v23 = vmul.f32 1.442695, %v3388_v44  ;;  %v3397_v40 = vld.sshfl [vmem:[#allocation1] sm:$0xff pattern:$0x75316420]  ;;  %v702_v29 = vmax.f32 %v700_v28, %v701_v10  ;;  %v3400_v8 = vsub.f32 %v4885_v55, %v762_v13  ;;  %v763_v31 = vsel %vm478_vm0, %v653_v39, %v747_v21 }
  0x7e   : > { %v2748_v24 = vpop.eup %2747  ;;  %v3402_v52 = vld.sshfl [vmem:[#allocation1 + $0x8] sm:$0xff pattern:$0x75316420]  ;;  %v3404_v48 = vld.sshfl [vmem:[#allocation1 + $0x10] sm:$0xff pattern:$0x75316420]  ;;  %v764_v33 = vsel %vm478_vm0, %v667_v60, %v748_v15  ;;  %v765_v11 = vsel %vm478_vm0, %v681_v34, %v749_v62  ;;  %v695_v28 = vmax.f32 %v693_v50, %v694_v6  ;;  %v3421_v61 = vsub.f32 %v4886_v22, %v763_v31 }
  0x7f   : > { %v2750_v12 = vpop.eup %2749  ;;  %v3406_v43 = vld.sshfl [vmem:[#allocation1 + $0x18] sm:$0xff pattern:$0x75316420]  ;;  %v3408_v26 = vld.sshfl [vmem:[#allocation1 + $0x20] sm:$0xff pattern:$0x75316420]  ;;  %v3424_v36 = vsub.f32 %v4887_v42, %v764_v33  ;;  %2755 = vpow2.f32 %v815_v56  ;;  %v3427_v58 = vsub.f32 %v4888_v54, %v765_v11 }
  0x80   : > { %v2752_v47 = vpop.eup %2751  ;;  %v3412_v57 = vld.sshfl [vmem:[#allocation1 + $0x28] sm:$0xff pattern:$0x75316420]  ;;  %v3414_v18 = vld.sshfl [vmem:[#allocation1 + $0x30] sm:$0xff pattern:$0x75316420]  ;;  %2757 = vpow2.f32 %v817_v30 }
  0x81   : > { %v2754_v32 = vpop.eup %2753  ;;  %v3417_v51 = vld.sshfl [vmem:[#allocation1 + $0x38] sm:$0xff pattern:$0x75316420]  ;;  %862 = vst [vmem:[#allocation1] ss:$2 sm:$0xff] %v2748_v24  ;;  %v750_v27 = vrot.slane %v702_v29, 4  ;;  %2759 = vpow2.f32 %v819_v23 }
  0x82   : > { %v821_v41 = vmul.f32 1.442695, %v3400_v8  ;;  %863 = vst [vmem:[#allocation1 + $0x10] ss:$2 sm:$0xff] %v2750_v12  ;;  %v823_v9 = vmul.f32 1.442695, %v3421_v61 }
  0x83   : > { %864 = vst [vmem:[#allocation1 + $0x20] ss:$2 sm:$0xff] %v2752_v47  ;;  %v766_v50 = vsel %vm478_vm0, %v695_v28, %v750_v27  ;;  %v825_v38 = vmul.f32 1.442695, %v3424_v36  ;;  %v827_v39 = vmul.f32 1.442695, %v3427_v58 }
  0x84   : > { %865 = vst [vmem:[#allocation1 + $0x30] ss:$2 sm:$0xff] %v2754_v32  ;;  %2761 = vpow2.f32 %v821_v41  ;;  %v4889_v6 = vld [vmem:[#allocation26_spill] sm:$0xff] }
  0x85   : > { %v2756_v60 = vpop.eup %2755  ;;  %v3436_v13 = vsub.f32 %v4889_v6, %v766_v50  ;;  %2763 = vpow2.f32 %v823_v9 }
  0x86   : > { %v2758_v56 = vpop.eup %2757  ;;  %2765 = vpow2.f32 %v825_v38 }
  0x87   : > { %v2760_v62 = vpop.eup %2759  ;;  %v829_v47 = vmul.f32 1.442695, %v3436_v13  ;;  %2767 = vpow2.f32 %v827_v39 }
  0x88   : > { %v3433_v10 = vld.sshfl [vmem:[#allocation1] sm:$0xff pattern:$0x75316420]  ;;  %v3438_v21 = vld.sshfl [vmem:[#allocation1 + $0x8] sm:$0xff pattern:$0x75316420] }
  0x89   : > { %v3440_v15 = vld.sshfl [vmem:[#allocation1 + $0x10] sm:$0xff pattern:$0x75316420]  ;;  %v3442_v30 = vld.sshfl [vmem:[#allocation1 + $0x18] sm:$0xff pattern:$0x75316420]  ;;  %2769 = vpow2.f32 %v829_v47 }
  0x8a   : > { %v3444_v34 = vld.sshfl [vmem:[#allocation1 + $0x20] sm:$0xff pattern:$0x75316420]  ;;  %v3446_v23 = vld.sshfl [vmem:[#allocation1 + $0x28] sm:$0xff pattern:$0x75316420]  ;;  %v2762_v29 = vpop.eup %2761 }
  0x8b   : > { %v3448_v24 = vld.sshfl [vmem:[#allocation1 + $0x30] sm:$0xff pattern:$0x75316420]  ;;  %v3450_v12 = vld.sshfl [vmem:[#allocation1 + $0x38] sm:$0xff pattern:$0x75316420]  ;;  %v2764_v33 = vpop.eup %2763 }
  0x8c   : > { %874 = vst [vmem:[#allocation1] ss:$2 sm:$0xff] %v2756_v60  ;;  %v2766_v28 = vpop.eup %2765 }
  0x8d   : > { %875 = vst [vmem:[#allocation1 + $0x10] ss:$2 sm:$0xff] %v2758_v56  ;;  %v2768_v50 = vpop.eup %2767 }
  0x8e   : > { %876 = vst [vmem:[#allocation1 + $0x20] ss:$2 sm:$0xff] %v2760_v62 }
  0x8f   : > { %877 = vst [vmem:[#allocation1 + $0x30] ss:$2 sm:$0xff] %v2762_v29  ;;  %v2770_v38 = vpop.eup %2769 }
  0x93   : > { %v3453_v31 = vld.sshfl [vmem:[#allocation1] sm:$0xff pattern:$0x75316420]  ;;  %v3455_v32 = vld.sshfl [vmem:[#allocation1 + $0x8] sm:$0xff pattern:$0x75316420] }
  0x94   : > { %v3457_v11 = vld.sshfl [vmem:[#allocation1 + $0x10] sm:$0xff pattern:$0x75316420]  ;;  %v3459_v27 = vld.sshfl [vmem:[#allocation1 + $0x18] sm:$0xff pattern:$0x75316420] }
  0x95   : > { %v3461_v41 = vld.sshfl [vmem:[#allocation1 + $0x20] sm:$0xff pattern:$0x75316420]  ;;  %v3463_v60 = vld.sshfl [vmem:[#allocation1 + $0x28] sm:$0xff pattern:$0x75316420] }
  0x96   : > { %v3465_v9 = vld.sshfl [vmem:[#allocation1 + $0x30] sm:$0xff pattern:$0x75316420]  ;;  %v3467_v39 = vld.sshfl [vmem:[#allocation1 + $0x38] sm:$0xff pattern:$0x75316420] }
  0x97   : > { %886 = vst [vmem:[#allocation1] ss:$2 sm:$0xff] %v2764_v33 }
  0x98   : > { %887 = vst [vmem:[#allocation1 + $0x10] ss:$2 sm:$0xff] %v2766_v28 }
  0x99   : > { %888 = vst [vmem:[#allocation1 + $0x20] ss:$2 sm:$0xff] %v2768_v50 }
  0x9a   : > { %889 = vst [vmem:[#allocation1 + $0x30] ss:$2 sm:$0xff] %v2770_v38 }
  0x9e   : > { %v3469_v56 = vld.sshfl [vmem:[#allocation1] sm:$0xff pattern:$0x75316420]  ;;  %v3471_v62 = vld.sshfl [vmem:[#allocation1 + $0x8] sm:$0xff pattern:$0x75316420] }
  0x9f   : > { %v3473_v29 = vld.sshfl [vmem:[#allocation1 + $0x10] sm:$0xff pattern:$0x75316420]  ;;  %v3475_v47 = vld.sshfl [vmem:[#allocation1 + $0x18] sm:$0xff pattern:$0x75316420] }
  0xa0   : > { %v3477_v6 = vld.sshfl [vmem:[#allocation1 + $0x20] sm:$0xff pattern:$0x75316420]  ;;  %v3479_v54 = vld.sshfl [vmem:[#allocation1 + $0x28] sm:$0xff pattern:$0x75316420] }
  0xa1   : > { %v3481_v42 = vld.sshfl [vmem:[#allocation1 + $0x30] sm:$0xff pattern:$0x75316420]  ;;  %v3483_v22 = vld.sshfl [vmem:[#allocation1 + $0x38] sm:$0xff pattern:$0x75316420] }
  0xa2   : > { %4890 = vst [vmem:[#allocation27_spill] sm:$0xff] %v3483_v22 }
  0xa3   : > { %1234 = vst [vmem:[#allocation1] ss:$2 sm:$0xff] %v3323_v53 }
  0xa4   : > { %1236 = vst [vmem:[#allocation1 + $0x10] ss:$2 sm:$0xff] %v3326_v59 }
  0xa5   : > { %1238 = vst [vmem:[#allocation1 + $0x20] ss:$2 sm:$0xff] %v3329_v25 }
  0xa6   : > { %1240 = vst [vmem:[#allocation1 + $0x30] ss:$2 sm:$0xff] %v3333_v35 }
  0xaa   : > { %v3489_v33 = vld.sshfl [vmem:[#allocation1] sm:$0xff pattern:$0x75316420]  ;;  %v3491_v28 = vld.sshfl [vmem:[#allocation1 + $0x8] sm:$0xff pattern:$0x75316420] }
  0xab   : > { %4891 = vst [vmem:[#allocation28_spill] sm:$0xff] %v3489_v33  ;;  %v3494_v50 = vld.sshfl [vmem:[#allocation1 + $0x10] sm:$0xff pattern:$0x75316420] }
  0xac   : > { %4892 = vst [vmem:[#allocation29_spill] sm:$0xff] %v3491_v28  ;;  %v3496_v38 = vld.sshfl [vmem:[#allocation1 + $0x18] sm:$0xff pattern:$0x75316420] }
  0xad   : > { %1249 = vst [vmem:[#allocation1] ss:$2 sm:$0xff] %v3354_v63  ;;  %v3498_v55 = vld.sshfl [vmem:[#allocation1 + $0x20] sm:$0xff pattern:$0x75316420] }
  0xae   : > { %4893 = vst [vmem:[#allocation30_spill] sm:$0xff] %v3494_v50  ;;  %v3500_v19 = vld.sshfl [vmem:[#allocation1 + $0x28] sm:$0xff pattern:$0x75316420] }
  0xaf   : > { %4894 = vst [vmem:[#allocation31_spill] sm:$0xff] %v3496_v38  ;;  %v3504_v53 = vld.sshfl [vmem:[#allocation1 + $0x30] sm:$0xff pattern:$0x75316420] }
  0xb0   : > { %4895 = vst [vmem:[#allocation32_spill] sm:$0xff] %v3498_v55  ;;  %v3506_v59 = vld.sshfl [vmem:[#allocation1 + $0x38] sm:$0xff pattern:$0x75316420] }
  0xb1   : > { %4896 = vst [vmem:[#allocation33_spill] sm:$0xff] %v3500_v19 }
  0xb2   : > { %1250 = vst [vmem:[#allocation1 + $0x10] ss:$2 sm:$0xff] %v3359_v45 }
  0xb3   : > { %1251 = vst [vmem:[#allocation1 + $0x20] ss:$2 sm:$0xff] %v3363_v49 }
  0xb4   : > { %4897 = vst [vmem:[#allocation34_spill] sm:$0xff] %v3504_v53  ;;  %v3509_v25 = vld.sshfl [vmem:[#allocation1] sm:$0xff pattern:$0x75316420] }
  0xb5   : > { %4898 = vst [vmem:[#allocation35_spill] sm:$0xff] %v3506_v59  ;;  %v3511_v35 = vld.sshfl [vmem:[#allocation1 + $0x8] sm:$0xff pattern:$0x75316420] }
  0xb6   : > { %1252 = vst [vmem:[#allocation1 + $0x30] ss:$2 sm:$0xff] %v3367_v37  ;;  %v930_v37 = vsel %vm478_vm0, %v3397_v40, 0.0  ;;  %v958_v40 = vsel %vm478_vm0, %v3408_v26, 0.0 }
  0xb7   : > { %4899 = vst [vmem:[#allocation36_spill] sm:$0xff] %v3509_v25 }
  0xb8   : > { %4900 = vst [vmem:[#allocation37_spill] sm:$0xff] %v3511_v35 }
  0xb9   : > { %1261 = vst [vmem:[#allocation1] ss:$2 sm:$0xff] %v3382_v20  ;;  %v3514_v63 = vld.sshfl [vmem:[#allocation1 + $0x10] sm:$0xff pattern:$0x75316420]  ;;  %v937_v20 = vsel %vm478_vm0, %v3402_v52, 0.0 }
  0xba   : > { %4901 = vst [vmem:[#allocation38_spill] sm:$0xff] %v3514_v63  ;;  %v3516_v17 = vld.sshfl [vmem:[#allocation1 + $0x18] sm:$0xff pattern:$0x75316420] }
  0xbb   : > { %4902 = vst [vmem:[#allocation39_spill] sm:$0xff] %v3516_v17  ;;  %v3519_v45 = vld.sshfl [vmem:[#allocation1 + $0x20] sm:$0xff pattern:$0x75316420] }
  0xbc   : > { %1262 = vst [vmem:[#allocation1 + $0x10] ss:$2 sm:$0xff] %v3385_v46  ;;  %v3521_v49 = vld.sshfl [vmem:[#allocation1 + $0x28] sm:$0xff pattern:$0x75316420]  ;;  %v931_v46 = vrot.slane %v930_v37, 4 }
  0xbd   : > { %4903 = vst [vmem:[#allocation40_spill] sm:$0xff] %v3519_v45  ;;  %v3523_v16 = vld.sshfl [vmem:[#allocation1 + $0x30] sm:$0xff pattern:$0x75316420]  ;;  %v938_v45 = vrot.slane %v937_v20, 4 }
  0xbe   : > { %4904 = vst [vmem:[#allocation41_spill] sm:$0xff] %v3521_v49  ;;  %v3525_v14 = vld.sshfl [vmem:[#allocation1 + $0x38] sm:$0xff pattern:$0x75316420]  ;;  %v944_v49 = vsel %vm478_vm0, %v3404_v48, 0.0 }
  0xbf   : > { %4905 = vst [vmem:[#allocation42_spill] sm:$0xff] %v3523_v16  ;;  %v951_v16 = vsel %vm478_vm0, %v3406_v43, 0.0  ;;  %v945_v63 = vrot.slane %v944_v49, 4  ;;  %v965_v43 = vsel %vm478_vm0, %v3412_v57, 0.0  ;;  %v939_v57 = vadd.f32 %v938_v45, %v937_v20 }
  0xc0   : > { %4906 = vst [vmem:[#allocation43_spill] sm:$0xff] %v3525_v14  ;;  %v3533_v7 = vld.sshfl [vmem:[#allocation1] sm:$0xff pattern:$0x75316420]  ;;  %v952_v48 = vrot.slane %v951_v16, 4 }
  0xc1   : > { %1263 = vst [vmem:[#allocation1 + $0x20] ss:$2 sm:$0xff] %v3388_v44  ;;  %v3539_v14 = vld.sshfl [vmem:[#allocation1 + $0x8] sm:$0xff pattern:$0x75316420]  ;;  %v946_v5 = vadd.f32 %v945_v63, %v944_v49  ;;  %v1007_v49 = vsel %vm478_vm0, %v3442_v30, 0.0 }
  0xc2   : > { %1264 = vst [vmem:[#allocation1 + $0x30] ss:$2 sm:$0xff] %v3400_v8  ;;  %v1021_v30 = vsel %vm478_vm0, %v3446_v23, 0.0 }
  0xc3   : > { %4907 = vst [vmem:[#allocation44_spill] sm:$0xff] %v3533_v7  ;;  %v3541_v44 = vld.sshfl [vmem:[#allocation1 + $0x10] sm:$0xff pattern:$0x75316420]  ;;  %v947_v45 = vrot.slane %v946_v5, 2 }
  0xc4   : > { %4908 = vst [vmem:[#allocation45_spill] sm:$0xff] %v3539_v14  ;;  %v3545_v52 = vld.sshfl [vmem:[#allocation1 + $0x18] sm:$0xff pattern:$0x75316420]  ;;  %v972_v14 = vsel %vm478_vm0, %v3414_v18, 0.0  ;;  %v953_v18 = vadd.f32 %v952_v48, %v951_v16 }
  0xc5   : > { %4909 = vst [vmem:[#allocation46_spill] sm:$0xff] %v3541_v44  ;;  %v973_v17 = vrot.slane %v972_v14, 4 }
  0xc6   : > { %4910 = vst [vmem:[#allocation47_spill] sm:$0xff] %v3545_v52  ;;  %v959_v52 = vrot.slane %v958_v40, 4  ;;  %v954_v63 = vrot.slane %v953_v18, 2 }
  0xc7   : > { %1273 = vst [vmem:[#allocation1] ss:$2 sm:$0xff] %v3421_v61  ;;  %v979_v61 = vsel %vm478_vm0, %v3417_v51, 0.0  ;;  %v974_v25 = vadd.f32 %v973_v17, %v972_v14  ;;  %v1008_v14 = vrot.slane %v1007_v49, 4  ;;  %v1014_v17 = vsel %vm478_vm0, %v3444_v34, 0.0 }
  0xc8   : > { %v3548_v8 = vld.sshfl [vmem:[#allocation1 + $0x20] sm:$0xff pattern:$0x75316420]  ;;  %v3550_v7 = vld.sshfl [vmem:[#allocation1 + $0x28] sm:$0xff pattern:$0x75316420]  ;;  %v955_v59 = vadd.f32 %v954_v63, %v953_v18 }
  0xc9   : > { %4911 = vst [vmem:[#allocation48_spill] sm:$0xff] %v3548_v8  ;;  %v3557_v44 = vld.sshfl [vmem:[#allocation1 + $0x30] sm:$0xff pattern:$0x75316420]  ;;  %v932_v8 = vadd.f32 %v931_v46, %v930_v37  ;;  %v980_v35 = vrot.slane %v979_v61, 4  ;;  %v940_v37 = vrot.slane %v939_v57, 2 }
  0xca   : > { %4912 = vst [vmem:[#allocation49_spill] sm:$0xff] %v3550_v7  ;;  %v3559_v26 = vld.sshfl [vmem:[#allocation1 + $0x38] sm:$0xff pattern:$0x75316420]  ;;  %v966_v7 = vrot.slane %v965_v43, 4 }
  0xcb   : > { %1274 = vst [vmem:[#allocation1 + $0x10] ss:$2 sm:$0xff] %v3424_v36  ;;  %v986_v36 = vsel %vm478_vm0, %v3433_v10, 0.0  ;;  %v933_v4 = vrot.slane %v932_v8, 2  ;;  %v981_v16 = vadd.f32 %v980_v35, %v979_v61 }
  0xcc   : > { %4913 = vst [vmem:[#allocation50_spill] sm:$0xff] %v3557_v44  ;;  %v993_v44 = vsel %vm478_vm0, %v3438_v21, 0.0  ;;  %v967_v51 = vadd.f32 %v966_v7, %v965_v43  ;;  %v987_v46 = vrot.slane %v986_v36, 4  ;;  %v948_v43 = vadd.f32 %v947_v45, %v946_v5 }
  0xcd   : > { %4914 = vst [vmem:[#allocation51_spill] sm:$0xff] %v3559_v26  ;;  %v960_v26 = vadd.f32 %v959_v52, %v958_v40  ;;  %v934_v48 = vadd.f32 %v933_v4, %v932_v8  ;;  %v975_v40 = vrot.slane %v974_v25, 2  ;;  %v982_v3 = vrot.slane %v981_v16, 2 }
  0xce   : > { %1275 = vst [vmem:[#allocation1 + $0x20] ss:$2 sm:$0xff] %v3427_v58  ;;  %v1000_v58 = vsel %vm478_vm0, %v3440_v15, 0.0  ;;  %v968_v21 = vrot.slane %v967_v51, 2  ;;  %v988_v52 = vadd.f32 %v987_v46, %v986_v36  ;;  %v941_v15 = vadd.f32 %v940_v37, %v939_v57 }
  0xcf   : > { %1276 = vst [vmem:[#allocation1 + $0x30] ss:$2 sm:$0xff] %v3436_v13  ;;  %v994_v13 = vrot.slane %v993_v44, 4  ;;  %v961_v10 = vrot.slane %v960_v26, 2  ;;  %v1001_v20 = vrot.slane %v1000_v58, 4  ;;  %v1028_v4 = vsel %vm478_vm0, %v3448_v24, 0.0 }
  0xd0   : > { %v969_v8 = vadd.f32 %v968_v21, %v967_v51  ;;  %v976_v61 = vadd.f32 %v975_v40, %v974_v25  ;;  %v1015_v36 = vrot.slane %v1014_v17, 4  ;;  %v935_v46 = vrot.slane %v934_v48, 1 }
  0xd1   : > { %v995_v7 = vadd.f32 %v994_v13, %v993_v44  ;;  %v962_v2 = vadd.f32 %v961_v10, %v960_v26  ;;  %v1002_v35 = vadd.f32 %v1001_v20, %v1000_v58  ;;  %v1035_v44 = vsel %vm478_vm0, %v3450_v12, 0.0 }
  0xd2   : > { %v989_v34 = vrot.slane %v988_v52, 2  ;;  %v1009_v5 = vadd.f32 %v1008_v14, %v1007_v49  ;;  %v942_v18 = vrot.slane %v941_v15, 1  ;;  %v949_v37 = vrot.slane %v948_v43, 1 }
  0xd3   : > { %v996_v57 = vrot.slane %v995_v7, 2  ;;  %v1022_v26 = vrot.slane %v1021_v30, 4  ;;  %v1029_v58 = vrot.slane %v1028_v4, 4  ;;  %v956_v13 = vrot.slane %v955_v59, 1 }
  0xd4   : > { %v983_v45 = vadd.f32 %v982_v3, %v981_v16  ;;  %v1003_v23 = vrot.slane %v1002_v35, 2  ;;  %v1036_v63 = vrot.slane %v1035_v44, 4  ;;  %v963_v10 = vrot.slane %v962_v2, 1 }
  0xd5   : > { %v970_v24 = vrot.slane %v969_v8, 1  ;;  %v977_v51 = vrot.slane %v976_v61, 1  ;;  %v1016_v25 = vadd.f32 %v1015_v36, %v1014_v17  ;;  %v936_v20 = vadd.f32 %v935_v46, %v934_v48 }
  0xd6   : > { %v990_v21 = vadd.f32 %v989_v34, %v988_v52  ;;  %v997_v40 = vadd.f32 %v996_v57, %v995_v7  ;;  %v1010_v12 = vrot.slane %v1009_v5, 2  ;;  %v943_v1 = vadd.f32 %v942_v18, %v941_v15 }
  0xd7   : > { %v950_v53 = vadd.f32 %v949_v37, %v948_v43  ;;  %v1023_v0 = vadd.f32 %v1022_v26, %v1021_v30  ;;  %v1030_v49 = vadd.f32 %v1029_v58, %v1028_v4  ;;  %v957_v14 = vadd.f32 %v956_v13, %v955_v59 }
  0xd8   : > { %v984_v19 = vrot.slane %v983_v45, 1  ;;  %v1004_v55 = vadd.f32 %v1003_v23, %v1002_v35  ;;  %v1037_v38 = vadd.f32 %v1036_v63, %v1035_v44  ;;  %v964_v50 = vadd.f32 %v963_v10, %v962_v2 }
  0xd9   : > { %v971_v3 = vadd.f32 %v970_v24, %v969_v8  ;;  %v3581_v16 = vadd.f32 %v977_v51, %v976_v61  ;;  %v1017_v28 = vrot.slane %v1016_v25, 2  ;;  %v991_v33 = vrot.slane %v990_v21, 1 }
  0xda   : > { %v998_v22 = vrot.slane %v997_v40, 1  ;;  %v1011_v17 = vadd.f32 %v1010_v12, %v1009_v5  ;;  %v1042_v48 = vsel %vm478_vm0, %v3453_v31, 0.0  ;;  %v1024_v52 = vrot.slane %v1023_v0, 2 }
  0xdb   : > { %v1031_v7 = vrot.slane %v1030_v49, 2  ;;  %v1049_v15 = vsel %vm478_vm0, %v3455_v32, 0.0  ;;  %v1056_v59 = vsel %vm478_vm0, %v3457_v11, 0.0  ;;  %v3589_v43 = vadd.f32 %v984_v19, %v983_v45 }
  0xdc   : > { %v1005_v2 = vrot.slane %v1004_v55, 1  ;;  %v1038_v35 = vrot.slane %v1037_v38, 2  ;;  %2771 = vlog2.f32 %v936_v20  ;;  %v1018_v30 = vadd.f32 %v1017_v28, %v1016_v25 }
  0xdd   : > { %v1043_v4 = vrot.slane %v1042_v48, 4  ;;  %v1063_v8 = vsel %vm478_vm0, %v3459_v27, 0.0  ;;  %2773 = vlog2.f32 %v943_v1  ;;  %v3593_v31 = vadd.f32 %v991_v33, %v990_v21 }
  0xde   : > { %v1012_v61 = vrot.slane %v1011_v17, 1  ;;  %v1050_v36 = vrot.slane %v1049_v15, 4  ;;  %v1057_v44 = vrot.slane %v1056_v59, 4  ;;  %v3595_v32 = vadd.f32 %v998_v22, %v997_v40 }
  0xdf   : > { %v1025_v46 = vadd.f32 %v1024_v52, %v1023_v0  ;;  %v1032_v11 = vadd.f32 %v1031_v7, %v1030_v49  ;;  %2775 = vlog2.f32 %v950_v53  ;;  %v3597_v19 = vadd.f32 %v1005_v2, %v1004_v55 }
  0xe0   : > { %v1039_v34 = vadd.f32 %v1038_v35, %v1037_v38  ;;  %v1064_v57 = vrot.slane %v1063_v8, 4  ;;  %2777 = vlog2.f32 %v957_v14  ;;  %v1019_v28 = vrot.slane %v1018_v30, 1 }
  0xe1   : > { %v1044_v5 = vadd.f32 %v1043_v4, %v1042_v48  ;;  %v1070_v1 = vsel %vm478_vm0, %v3461_v41, 0.0  ;;  %2779 = vlog2.f32 %v964_v50  ;;  %v1051_v33 = vadd.f32 %v1050_v36, %v1049_v15 }
  0xe2   : > { %v3601_v27 = vpop.eup %2771  ;;  %v1058_v18 = vadd.f32 %v1057_v44, %v1056_v59  ;;  %v1077_v0 = vsel %vm478_vm0, %v3463_v60, 0.0  ;;  %v1084_v55 = vsel %vm478_vm0, %v3465_v9, 0.0  ;;  %v3609_v38 = vadd.f32 %v1012_v61, %v1011_v17  ;;  %v4915_v44 = vld [vmem:[#allocation27_spill] sm:$0xff] }
  0xe3   : > { %v3607_v22 = vpop.eup %2773  ;;  %v1026_v53 = vrot.slane %v1025_v46, 1  ;;  %v1033_v37 = vrot.slane %v1032_v11, 1  ;;  %2781 = vlog2.f32 %v971_v3  ;;  %v1040_v26 = vrot.slane %v1039_v34, 1 }
  0xe4   : > { %v1065_v41 = vadd.f32 %v1064_v57, %v1063_v8  ;;  %v1071_v50 = vrot.slane %v1070_v1, 4  ;;  %v1091_v58 = vsel %vm478_vm0, %v3467_v39, 0.0  ;;  %v1078_v45 = vrot.slane %v1077_v0, 4 }
  0xe5   : > { %v3613_v13 = vpop.eup %2775  ;;  %v1085_v60 = vrot.slane %v1084_v55, 4  ;;  %v1098_v9 = vsel %vm478_vm0, %v3469_v56, 0.0  ;;  %v1105_v23 = vsel %vm478_vm0, %v3471_v62, 0.0  ;;  %v3621_v10 = vadd.f32 %v1019_v28, %v1018_v30 }
  0xe6   : > { %v3619_v63 = vpop.eup %2777  ;;  %v1045_v24 = vrot.slane %v1044_v5, 2  ;;  %v1052_v51 = vrot.slane %v1051_v33, 2  ;;  %v1059_v25 = vrot.slane %v1058_v18, 2  ;;  %v3625_v39 = vadd.f32 %v1026_v53, %v1025_v46 }
  0xe7   : > { %v3623_v20 = vpop.eup %2779  ;;  %v3627_v21 = vadd.f32 %v1033_v37, %v1032_v11  ;;  %v1092_v40 = vrot.slane %v1091_v58, 4  ;;  %v1112_v56 = vsel %vm478_vm0, %v3473_v29, 0.0  ;;  %v3631_v12 = vadd.f32 %v1040_v26, %v1039_v34 }
  0xe8   : > { %v1099_v62 = vrot.slane %v1098_v9, 4  ;;  %v1106_v49 = vrot.slane %v1105_v23, 4  ;;  %v1119_v14 = vsel %vm478_vm0, %v3475_v47, 0.0  ;;  %v1066_v17 = vrot.slane %v1065_v41, 2 }
  0xe9   : > { %v3635_v3 = vpop.eup %2781  ;;  %v1072_v48 = vadd.f32 %v1071_v50, %v1070_v1  ;;  %v1079_v52 = vadd.f32 %v1078_v45, %v1077_v0  ;;  %v1086_v7 = vadd.f32 %v1085_v60, %v1084_v55  ;;  %v1046_v15 = vadd.f32 %v1045_v24, %v1044_v5 }
  0xea   : > { %v1053_v59 = vadd.f32 %v1052_v51, %v1051_v33  ;;  %v1060_v2 = vadd.f32 %v1059_v25, %v1058_v18  ;;  %v1113_v35 = vrot.slane %v1112_v56, 4  ;;  %v1093_v30 = vadd.f32 %v1092_v40, %v1091_v58 }
  0xeb   : > { %v1120_v4 = vrot.slane %v1119_v14, 4  ;;  %v1126_v29 = vsel %vm478_vm0, %v3477_v6, 0.0  ;;  %v1133_v8 = vsel %vm478_vm0, %v3479_v54, 0.0  ;;  %v1100_v61 = vadd.f32 %v1099_v62, %v1098_v9 }
  0xec   : > { %v1107_v47 = vadd.f32 %v1106_v49, %v1105_v23  ;;  %v1140_v36 = vsel %vm478_vm0, %v3481_v42, 0.0  ;;  %v1147_v46 = vsel %vm478_vm0, %v4915_v44, 0.0  ;;  %v1067_v11 = vadd.f32 %v1066_v17, %v1065_v41 }
  0xed   : > { %v1073_v34 = vrot.slane %v1072_v48, 2  ;;  %v1080_v57 = vrot.slane %v1079_v52, 2  ;;  %v1087_v28 = vrot.slane %v1086_v7, 2  ;;  %v1047_v5 = vrot.slane %v1046_v15, 1 }
  0xee   : > { %v1114_v1 = vadd.f32 %v1113_v35, %v1112_v56  ;;  %v1127_v33 = vrot.slane %v1126_v29, 4  ;;  %v1134_v18 = vrot.slane %v1133_v8, 4  ;;  %v1054_v6 = vrot.slane %v1053_v59, 1 }
  0xef   : > { %v1094_v0 = vrot.slane %v1093_v30, 2  ;;  %v1141_v55 = vrot.slane %v1140_v36, 4  ;;  %v1148_v54 = vrot.slane %v1147_v46, 4  ;;  %v1061_v53 = vrot.slane %v1060_v2, 1 }
  0xf0   : > { %v1101_v37 = vrot.slane %v1100_v61, 2  ;;  %v1108_v26 = vrot.slane %v1107_v47, 2  ;;  %v1121_v50 = vadd.f32 %v1120_v4, %v1119_v14  ;;  %v1068_v42 = vrot.slane %v1067_v11, 1 }
  0xf1   : > { %v1074_v58 = vadd.f32 %v1073_v34, %v1072_v48  ;;  %v1081_v45 = vadd.f32 %v1080_v57, %v1079_v52  ;;  %v1088_v60 = vadd.f32 %v1087_v28, %v1086_v7  ;;  %v3645_v41 = vadd.f32 %v1047_v5, %v1046_v15 }
  0xf2   : > { %v1115_v9 = vrot.slane %v1114_v1, 2  ;;  %v1128_v23 = vadd.f32 %v1127_v33, %v1126_v29  ;;  %v1135_v24 = vadd.f32 %v1134_v18, %v1133_v8  ;;  %v1055_v51 = vadd.f32 %v1054_v6, %v1053_v59 }
  0xf3   : > { %v1095_v25 = vadd.f32 %v1094_v0, %v1093_v30  ;;  %v1142_v40 = vadd.f32 %v1141_v55, %v1140_v36  ;;  %v1149_v56 = vadd.f32 %v1148_v54, %v1147_v46  ;;  %v3647_v62 = vadd.f32 %v1061_v53, %v1060_v2 }
  0xf4   : > { %v1102_v49 = vadd.f32 %v1101_v37, %v1100_v61  ;;  %v1109_v17 = vadd.f32 %v1108_v26, %v1107_v47  ;;  %v1122_v35 = vrot.slane %v1121_v50, 2  ;;  %v3649_v44 = vadd.f32 %v1068_v42, %v1067_v11  ;;  %v4916_v42 = vld [vmem:[#allocation28_spill] sm:$0xff] }
  0xf5   : > { %v1075_v14 = vrot.slane %v1074_v58, 1  ;;  %v1082_v48 = vrot.slane %v1081_v45, 1  ;;  %v1089_v52 = vrot.slane %v1088_v60, 1  ;;  %v1116_v7 = vadd.f32 %v1115_v9, %v1114_v1 }
  0xf6   : > { %v1129_v15 = vrot.slane %v1128_v23, 2  ;;  %v1136_v4 = vrot.slane %v1135_v24, 2  ;;  %2783 = vlog2.f32 %v3581_v16  ;;  %v1096_v29 = vrot.slane %v1095_v25, 1 }
  0xf7   : > { %v1143_v59 = vrot.slane %v1142_v40, 2  ;;  %v1150_v30 = vrot.slane %v1149_v56, 2  ;;  %2785 = vlog2.f32 %v3589_v43  ;;  %v1103_v2 = vrot.slane %v1102_v49, 1 }
  0xf8   : > { %v1110_v8 = vrot.slane %v1109_v17, 1  ;;  %v1123_v61 = vadd.f32 %v1122_v35, %v1121_v50  ;;  %2787 = vlog2.f32 %v3593_v31  ;;  %v1076_v47 = vadd.f32 %v1075_v14, %v1074_v58  ;;  %v4917_v58 = vld [vmem:[#allocation29_spill] sm:$0xff] }
  0xf9   : > { %v1083_v36 = vadd.f32 %v1082_v48, %v1081_v45  ;;  %v1090_v46 = vadd.f32 %v1089_v52, %v1088_v60  ;;  %2789 = vlog2.f32 %v3595_v32  ;;  %v1117_v11 = vrot.slane %v1116_v7, 1  ;;  %v4921_v52 = vld [vmem:[#allocation33_spill] sm:$0xff] }
  0xfa   : > { %v1130_v34 = vadd.f32 %v1129_v15, %v1128_v23  ;;  %v1137_v57 = vadd.f32 %v1136_v4, %v1135_v24  ;;  %2791 = vlog2.f32 %v3597_v19  ;;  %v1097_v16 = vadd.f32 %v1096_v29, %v1095_v25 }
  0xfb   : > { %v1144_v28 = vadd.f32 %v1143_v59, %v1142_v40  ;;  %v1151_v5 = vadd.f32 %v1150_v30, %v1149_v56  ;;  %2793 = vlog2.f32 %v3609_v38  ;;  %v1104_v1 = vadd.f32 %v1103_v2, %v1102_v49  ;;  %v4924_v30 = vld [vmem:[#allocation12_spill] sm:$0xff] }
  0xfc   : > { %v2784_v43 = vpop.eup %2783  ;;  %v3657_v33 = vadd.f32 %v1110_v8, %v1109_v17  ;;  %v1124_v31 = vrot.slane %v1123_v61, 1  ;;  %2795 = vlog2.f32 %v3621_v10  ;;  %v3661_v32 = vmul.f32 0.6931472, %v3601_v27  ;;  %v4920_v17 = vld [vmem:[#allocation32_spill] sm:$0xff] }
  0xfd   : > { %v2786_v18 = vpop.eup %2785  ;;  %v3664_v6 = vmul.f32 0.6931472, %v3607_v22  ;;  %v3667_v19 = vmul.f32 0.6931472, %v3613_v13  ;;  %2797 = vlog2.f32 %v3625_v39  ;;  %v1118_v0 = vadd.f32 %v1117_v11, %v1116_v7  ;;  %v4922_v7 = vld [vmem:[#allocation11_spill] sm:$0xff] }
  0xfe   : > { %v2788_v38 = vpop.eup %2787  ;;  %v1131_v55 = vrot.slane %v1130_v34, 1  ;;  %v1138_v54 = vrot.slane %v1137_v57, 1  ;;  %2799 = vlog2.f32 %v3627_v21  ;;  %v1145_v10 = vrot.slane %v1144_v28, 1 }
  0xff   : > { %v2790_v53 = vpop.eup %2789  ;;  %v1152_v37 = vrot.slane %v1151_v5, 1  ;;  %v1161_v27 = vmul.f32 0.6931472, %v3619_v63  ;;  %2801 = vlog2.f32 %v3631_v12  ;;  %v1125_v26 = vadd.f32 %v1124_v31, %v1123_v61  ;;  %v4918_v63 = vld [vmem:[#allocation30_spill] sm:$0xff]  ;;  %v4929_v31 = vld [vmem:[#allocation15_spill] sm:$0xff] }
 0x100   : > { %v2792_v22 = vpop.eup %2791  ;;  %v3674_v13 = vmul.f32 0.6931472, %v3623_v20  ;;  %v1165_v39 = vmul.f32 0.6931472, %v3635_v3  ;;  %2803 = vlog2.f32 %v3645_v41  ;;  %v1317_v21 = vsub.f32 %v3661_v32, %v4916_v42 }
 0x101   : > { %v2794_v50 = vpop.eup %2793  ;;  %2805 = vlog2.f32 %v1055_v51  ;;  %v1318_v45 = vsub.f32 %v3664_v6, %v4917_v58  ;;  %v1319_v12 = vsub.f32 %v3667_v19, %v4918_v63  ;;  %v1132_v9 = vadd.f32 %v1131_v55, %v1130_v34  ;;  %v4919_v51 = vld [vmem:[#allocation31_spill] sm:$0xff]  ;;  %v4926_v34 = vld [vmem:[#allocation14_spill] sm:$0xff]  ;;  %v4930_v55 = vld [vmem:[#allocation37_spill] sm:$0xff] }
 0x102   : > { %v2796_v60 = vpop.eup %2795  ;;  %v1139_v23 = vadd.f32 %v1138_v54, %v1137_v57  ;;  %v3684_v20 = vmul.f32 0.6931472, %v2784_v43  ;;  %2807 = vlog2.f32 %v3647_v62  ;;  %v1146_v41 = vadd.f32 %v1145_v10, %v1144_v28  ;;  %v4927_v28 = vld [vmem:[#allocation35_spill] sm:$0xff]  ;;  %v4928_v43 = vld [vmem:[#allocation36_spill] sm:$0xff]  ;;  %v4933_v58 = vld [vmem:[#allocation38_spill] sm:$0xff] }
 0x103   : > { %v2798_v3 = vpop.eup %2797  ;;  %v1153_v24 = vadd.f32 %v1152_v37, %v1151_v5  ;;  %2809 = vlog2.f32 %v3649_v44  ;;  %v1320_v25 = vsub.f32 %v1161_v27, %v4919_v51  ;;  %v1169_v56 = vmul.f32 0.6931472, %v2786_v18  ;;  %v4923_v44 = vld [vmem:[#allocation34_spill] sm:$0xff]  ;;  %v4931_v54 = vld [vmem:[#allocation16_spill] sm:$0xff] }
 0x104   : > { %v2800_v40 = vpop.eup %2799  ;;  %v3689_v49 = vmul.f32 0.6931472, %v2788_v38  ;;  %2811 = vlog2.f32 %v1076_v47  ;;  %v1173_v48 = vmul.f32 0.6931472, %v2790_v53  ;;  %v1322_v62 = vsub.f32 %v1165_v39, %v4921_v52  ;;  %v4925_v47 = vld [vmem:[#allocation13_spill] sm:$0xff]  ;;  %v4934_v52 = vld [vmem:[#allocation40_spill] sm:$0xff] }
 0x105   : > { %v2802_v14 = vpop.eup %2801  ;;  %2813 = vlog2.f32 %v1083_v36  ;;  %v2655_v15 = vmul.f32 -1.442695, %v4922_v7  ;;  %v1177_v29 = vmul.f32 0.6931472, %v2794_v50  ;;  %v2656_v2 = vmul.f32 -1.442695, %v4924_v30 }
 0x106   : > { %v2804_v4 = vpop.eup %2803  ;;  %2815 = vlog2.f32 %v1090_v46  ;;  %v3698_v61 = vmul.f32 0.6931472, %v2792_v22  ;;  %v2657_v11 = vmul.f32 -1.442695, %v4925_v47  ;;  %v2658_v36 = vmul.f32 -1.442695, %v4926_v34 }
 0x107   : > { %v2806_v8 = vpop.eup %2805  ;;  %2817 = vlog2.f32 %v1097_v16  ;;  %v1324_v5 = vsub.f32 %v1169_v56, %v4927_v28  ;;  %v2659_v18 = vmul.f32 -1.442695, %v4929_v31  ;;  %v3706_v38 = vmul.f32 0.6931472, %v2796_v60  ;;  %v4936_v47 = vld [vmem:[#allocation43_spill] sm:$0xff]  ;;  %v4949_v46 = vld [vmem:[#allocation25_spill] sm:$0xff] }
 0x108   : > { %v2808_v57 = vpop.eup %2807  ;;  %2819 = vlog2.f32 %v1104_v1  ;;  %v1326_v16 = vsub.f32 %v1173_v48, %v4930_v55  ;;  %v2660_v53 = vmul.f32 -1.442695, %v4931_v54  ;;  %v3711_v37 = vmul.f32 0.6931472, %v2798_v3  ;;  %v4932_v1 = vld [vmem:[#allocation39_spill] sm:$0xff] }
 0x109   : > { %v2810_v6 = vpop.eup %2809  ;;  %2821 = vlog2.f32 %v3657_v33  ;;  %v1328_v27 = vsub.f32 %v1177_v29, %v4932_v1  ;;  %v3714_v22 = vrot.slane %v1318_v45, 4  ;;  %v3716_v50 = vmul.f32 0.6931472, %v2802_v14 }
 0x10a   : > { %v2812_v10 = vpop.eup %2811  ;;  %2823 = vlog2.f32 %v1118_v0  ;;  %v3720_v33 = vrot.slane %v1320_v25, 4  ;;  %v3722_v56 = vmul.f32 0.6931472, %v2800_v40  ;;  %v3724_v3 = vrot.slane %v1322_v62, 4  ;;  %v4935_v25 = vld [vmem:[#allocation41_spill] sm:$0xff] }
 0x10b   : > { %v2814_v39 = vpop.eup %2813  ;;  %2825 = vlog2.f32 %v1125_v26  ;;  %v3726_v0 = vrot.slane %v1324_v5, 4  ;;  %v1189_v45 = vmul.f32 0.6931472, %v2806_v8  ;;  %v3730_v26 = vrot.slane %v1326_v16, 4  ;;  %v4937_v8 = vld [vmem:[#allocation17_spill] sm:$0xff] }
 0x10c   : > { %v2816_v51 = vpop.eup %2815  ;;  %2827 = vlog2.f32 %v1132_v9  ;;  %v3732_v29 = vmul.f32 0.6931472, %v2804_v4  ;;  %v1330_v40 = vsub.f32 %v3711_v37, %v4935_v25  ;;  %v3736_v9 = vrot.slane %v1328_v27, 4  ;;  %v4939_v16 = vld [vmem:[#allocation45_spill] sm:$0xff]  ;;  %v4940_v37 = vld [vmem:[#allocation19_spill] sm:$0xff] }
 0x10d   : > { %v2818_v48 = vpop.eup %2817  ;;  %2829 = vlog2.f32 %v1139_v23  ;;  %v1193_v30 = vmul.f32 0.6931472, %v2810_v6  ;;  %v1332_v23 = vsub.f32 %v3716_v50, %v4936_v47  ;;  %v2661_v34 = vmul.f32 -1.442695, %v4937_v8  ;;  %v4943_v8 = vld [vmem:[#allocation47_spill] sm:$0xff] }
 0x10e   : > { %v2820_v7 = vpop.eup %2819  ;;  %2831 = vlog2.f32 %v1146_v41  ;;  %v3741_v5 = vmul.f32 0.6931472, %v2808_v57  ;;  %v3743_v31 = vmul.f32 0.6931472, %v2814_v39  ;;  %v4938_v41 = vld [vmem:[#allocation18_spill] sm:$0xff]  ;;  %v1334_v54 = vsub.f32 %v1189_v45, %v4939_v16  ;;  %v4942_v57 = vld [vmem:[#allocation21_spill] sm:$0xff] }
 0x10f   : > { %v2822_v62 = vpop.eup %2821  ;;  %2833 = vlog2.f32 %v1153_v24  ;;  %v2662_v4 = vmul.f32 -1.442695, %v4938_v41  ;;  %v2663_v6 = vmul.f32 -1.442695, %v4940_v37  ;;  %v4941_v24 = vld [vmem:[#allocation20_spill] sm:$0xff]  ;;  %v1336_v41 = vsub.f32 %v1193_v30, %v4943_v8  ;;  %v4944_v45 = vld [vmem:[#allocation22_spill] sm:$0xff] }
 0x110   : > { %v2824_v28 = vpop.eup %2823  ;;  %2835 = vpow2.f32 %v2655_v15  ;;  %v2664_v1 = vmul.f32 -1.442695, %v4941_v24  ;;  %v3749_v50 = vmul.f32 0.6931472, %v2812_v10  ;;  %v3751_v25 = vmul.f32 0.6931472, %v2818_v48 }
 0x111   : > { %v2826_v55 = vpop.eup %2825  ;;  %2837 = vpow2.f32 %v2656_v2  ;;  %v2665_v39 = vmul.f32 -1.442695, %v4942_v57  ;;  %v3754_v15 = vmul.f32 0.6931472, %v2822_v62  ;;  %v2666_v2 = vmul.f32 -1.442695, %v4944_v45 }
 0x112   : > { %v2828_v27 = vpop.eup %2827  ;;  %2839 = vpow2.f32 %v2657_v11  ;;  %v3758_v37 = vmul.f32 0.6931472, %v2816_v51  ;;  %v3760_v24 = vld.sshfl [vmem:[#allocation1 + $0x8] sm:$0xff pattern:$0x75316420]  ;;  %v4945_v10 = vld [vmem:[#allocation49_spill] sm:$0xff]  ;;  %v4956_v19 = vsub.f32 %v3684_v20, %v4923_v44 }
 0x113   : > { %v2830_v47 = vpop.eup %2829  ;;  %2841 = vpow2.f32 %v2658_v36  ;;  %v1338_v48 = vsub.f32 %v3743_v31, %v4945_v10  ;;  %v4946_v11 = vld [vmem:[#allocation23_spill] sm:$0xff]  ;;  %v3765_v60 = vmul.f32 0.6931472, %v2820_v7  ;;  %v3767_v62 = vmul.f32 0.6931472, %v2826_v55  ;;  %v4947_v36 = vld [vmem:[#allocation24_spill] sm:$0xff] }
 0x114   : > { %v2832_v16 = vpop.eup %2831  ;;  %2843 = vpow2.f32 %v2659_v18  ;;  %v2667_v14 = vmul.f32 -1.442695, %v4946_v11  ;;  %v2668_v30 = vmul.f32 -1.442695, %v4947_v36  ;;  %v4948_v45 = vld [vmem:[#allocation51_spill] sm:$0xff]  ;;  %v4950_v18 = vld [vmem:[#allocation26_spill] sm:$0xff]  ;;  %v1704_v42 = vsel %vm478_vm0, %v4956_v19, %v3726_v0 }
 0x115   : > { %v2834_v57 = vpop.eup %2833  ;;  %2845 = vpow2.f32 %v2660_v53  ;;  %v1340_v51 = vsub.f32 %v3751_v25, %v4948_v45  ;;  %v2669_v31 = vmul.f32 -1.442695, %v4949_v46  ;;  %v2670_v10 = vmul.f32 -1.442695, %v4950_v18  ;;  %v3790_v18 = vld [vmem:[%s3110_s30 + $0x8] sm:$0xff] }
 0x116   : > { %v2836_v8 = vpop.eup %2835  ;;  %2847 = vpow2.f32 %v2661_v34  ;;  %v3774_v59 = vmul.f32 0.6931472, %v2824_v28  ;;  %v1280_v7 = vld.sshfl [vmem:[#allocation1 + $0x18] sm:$0xff pattern:$0x75316420]  ;;  %v1342_v53 = vsub.f32 %v3754_v15, %v3760_v24  ;;  %v3778_v55 = vrot.slane %v1330_v40, 4 }
 0x117   : > { %v2838_v11 = vpop.eup %2837  ;;  %2849 = vpow2.f32 %v2662_v4  ;;  %v3780_v36 = vmul.f32 0.6931472, %v2828_v27  ;;  %v3782_v34 = vrot.slane %v1332_v23, 4  ;;  %v3784_v46 = vrot.slane %v1334_v54, 4  ;;  %v3787_v28 = vld [vmem:[%s3110_s30] sm:$0xff]  ;;  %4952 = vst [vmem:[#allocation28_spill] sm:$0xff] %v3790_v18 }
 0x118   : > { %v2840_v25 = vpop.eup %2839  ;;  %2851 = vpow2.f32 %v2663_v6  ;;  %4951 = vst [vmem:[#allocation27_spill] sm:$0xff] %v3787_v28  ;;  %v3792_v35 = vmul.f32 0.6931472, %v2830_v47  ;;  %v1344_v4 = vsub.f32 %v3767_v62, %v1280_v7  ;;  %v3795_v40 = vrot.slane %v1336_v41, 4  ;;  %v3798_v27 = vld [vmem:[%s3110_s30 + $0x10] sm:$0xff]  ;;  %v3801_v6 = vld [vmem:[%s3110_s30 + $0x18] sm:$0xff] }
 0x119   : > { %v2842_v45 = vpop.eup %2841  ;;  %2853 = vpow2.f32 %v2664_v1  ;;  %4953 = vst [vmem:[#allocation29_spill] sm:$0xff] %v3798_v27  ;;  %v3803_v23 = vld.sshfl [vmem:[#allocation1] sm:$0xff pattern:$0x75316420]  ;;  %v1701_v54 = vsel %vm478_vm0, %v1317_v21, %v3714_v22  ;;  %v1702_v1 = vsel %vm478_vm0, %v1319_v12, %v3720_v33  ;;  %v4955_v47 = vsub.f32 %v3674_v13, %v4920_v17 }
 0x11a   : > { %v2844_v15 = vpop.eup %2843  ;;  %4954 = vst [vmem:[#allocation30_spill] sm:$0xff] %v3801_v6  ;;  %2855 = vpow2.f32 %v2665_v39  ;;  %v3820_v39 = vmul.f32 0.6931472, %v2832_v16  ;;  %v3822_v62 = vld.sshfl [vmem:[#allocation1 + $0x10] sm:$0xff pattern:$0x75316420]  ;;  %v1733_v20 = vmul.f32 %v1701_v54, %v3787_v28  ;;  %v1734_v44 = vmul.f32 %v1702_v1, %v3790_v18 }
 0x11b   : > { %v1703_v41 = vsel %vm478_vm0, %v4955_v47, %v3724_v3  ;;  %v2846_v24 = vpop.eup %2845  ;;  %2857 = vpow2.f32 %v2666_v2  ;;  %v3824_v32 = vrot.slane %v1338_v48, 4  ;;  %v3831_v63 = vmul.f32 0.6931472, %v2834_v57  ;;  %v3833_v13 = vld.sshfl [vmem:[#allocation1 + $0x20] sm:$0xff pattern:$0x75316420] }
 0x11c   : > { %v2848_v21 = vpop.eup %2847  ;;  %2859 = vpow2.f32 %v2667_v14  ;;  %v3835_v12 = vadd.f32 1.0, %v2836_v8  ;;  %v3837_v17 = vadd.f32 1.0, %v2838_v11  ;;  %v3839_v33 = vld.sshfl [vmem:[#allocation1 + $0x28] sm:$0xff pattern:$0x75316420]  ;;  %v1735_v0 = vmul.f32 %v1703_v41, %v3798_v27 }
 0x11d   : > { %v2850_v22 = vpop.eup %2849  ;;  %v3841_v3 = vld.sshfl [vmem:[#allocation1 + $0x30] sm:$0xff pattern:$0x75316420]  ;;  %2861 = vpow2.f32 %v2668_v30  ;;  %v3846_v16 = vld.sshfl [vmem:[#allocation1 + $0x38] sm:$0xff pattern:$0x75316420]  ;;  %v1736_v57 = vmul.f32 %v1704_v42, %v3801_v6 }
 0x11e   : > { %v2852_v2 = vpop.eup %2851  ;;  %2863 = vpow2.f32 %v2669_v31  ;;  %v3848_v14 = vadd.f32 1.0, %v2840_v25  ;;  %v1424_v48 = vand.u32 2147483648, %v3835_v12  ;;  %v3852_v11 = vadd.f32 1.0, %v2842_v45  ;;  %1960 = vst [vmem:[#allocation1] ss:$2 sm:$0xff] %v1733_v20  ;;  %v3879_v42 = vld [vmem:[%s3110_s30 + $0x20] sm:$0xff] }
 0x11f   : > { %v2854_v8 = vpop.eup %2853  ;;  %2865 = vpow2.f32 %v2670_v10  ;;  %v1439_v30 = vand.u32 2147483648, %v3837_v17  ;;  %v3855_v7 = vrot.slane %v1340_v51, 4  ;;  %v3857_v1 = vadd.f32 1.0, %v2844_v15  ;;  %1962 = vst [vmem:[#allocation1 + $0x10] ss:$2 sm:$0xff] %v1734_v44  ;;  %v4957_v10 = vld [vmem:[#allocation42_spill] sm:$0xff] }
 0x120   : > { %v2856_v54 = vpop.eup %2855  ;;  %2867 = vrcp.f32 %v3835_v12  ;;  %v3860_v31 = vrot.slane %v1342_v53, 4  ;;  %v3862_v25 = vrot.slane %v1344_v4, 4  ;;  %v1331_v45 = vsub.f32 %v3722_v56, %v4957_v10  ;;  %1964 = vst [vmem:[#allocation1 + $0x20] ss:$2 sm:$0xff] %v1735_v0 }
 0x121   : > { %v3864_v47 = vpop.eup %2857  ;;  %2869 = vrcp.f32 %v3837_v17  ;;  %v3871_v53 = vadd.f32 1.0, %v2846_v24  ;;  %v3873_v19 = vadd.f32 1.0, %v2848_v21  ;;  %v3875_v4 = vor.u32 1.1754944e-38, %v1424_v48  ;;  %1966 = vst [vmem:[#allocation1 + $0x30] ss:$2 sm:$0xff] %v1736_v57  ;;  %v3894_v48 = vld [vmem:[%s3110_s30 + $0x28] sm:$0xff] }
 0x122   : > { %v2860_v41 = vpop.eup %2859  ;;  %2871 = vrcp.f32 %v3848_v14  ;;  %4958 = vst [vmem:[#allocation31_spill] sm:$0xff] %v3879_v42  ;;  %v3881_v20 = vadd.f32 1.0, %v2850_v22  ;;  %v3883_v44 = vor.u32 1.1754944e-38, %v1439_v30  ;;  %v4959_v24 = vsub.f32 %v3689_v49, %v4928_v43  ;;  %v3906_v49 = vld [vmem:[%s3110_s30 + $0x30] sm:$0xff] }
 0x123   : > { %v2862_v56 = vpop.eup %2861  ;;  %2873 = vrcp.f32 %v3852_v11  ;;  %4960 = vst [vmem:[#allocation32_spill] sm:$0xff] %v3894_v48  ;;  %v3896_v57 = vadd.f32 1.0, %v2852_v2  ;;  %v4961_v30 = vsub.f32 %v3698_v61, %v4933_v58  ;;  %v3908_v43 = vadd.f32 1.0, %v2854_v8  ;;  %v3920_v61 = vld [vmem:[%s3110_s30 + $0x38] sm:$0xff] }
 0x124   : > { %v1705_v21 = vsel %vm478_vm0, %v4959_v24, %v3730_v26  ;;  %v3891_v0 = vpop.eup %2863  ;;  %2875 = vrcp.f32 %v3857_v1  ;;  %4962 = vst [vmem:[#allocation33_spill] sm:$0xff] %v3906_v49  ;;  %v1454_v26 = vand.u32 2147483648, %v3848_v14  ;;  %v4963_v24 = vsub.f32 %v3706_v38, %v4934_v52  ;;  %v4966_v38 = vld [vmem:[#allocation44_spill] sm:$0xff] }
 0x125   : > { %v1706_v10 = vsel %vm478_vm0, %v4961_v30, %v3736_v9  ;;  %v2866_v15 = vpop.eup %2865  ;;  %4964 = vst [vmem:[#allocation11_spill] sm:$0xff] %v3920_v61  ;;  %v3922_v58 = vadd.f32 1.0, %v2856_v54  ;;  %v1469_v9 = vand.u32 2147483648, %v3852_v11  ;;  %v1708_v8 = vsel %vm478_vm0, %v1331_v45, %v3782_v34  ;;  %v3928_v2 = vld.sshfl [vmem:[#allocation1] sm:$0xff pattern:$0x75316420] }
 0x126   : > { %v1707_v22 = vsel %vm478_vm0, %v4963_v24, %v3778_v55  ;;  %v3917_v51 = vpop.eup %2867  ;;  %v1737_v30 = vmul.f32 %v1705_v21, %v3879_v42  ;;  %4965 = vst [vmem:[#allocation34_spill] sm:$0xff] %v3928_v2  ;;  %v1333_v52 = vsub.f32 %v3732_v29, %v4966_v38  ;;  %v4967_v55 = vld [vmem:[#allocation46_spill] sm:$0xff]  ;;  %v1738_v54 = vmul.f32 %v1706_v10, %v3894_v48  ;;  %v3937_v27 = vld.sshfl [vmem:[#allocation1 + $0x8] sm:$0xff pattern:$0x75316420]  ;;  %v4970_v34 = vld [vmem:[#allocation48_spill] sm:$0xff] }
 0x127   : > { %v3930_v6 = vpop.eup %2869  ;;  %v1335_v24 = vsub.f32 %v3741_v5, %v4967_v55  ;;  %4968 = vst [vmem:[#allocation12_spill] sm:$0xff] %v3937_v27  ;;  %v3939_v18 = vld.sshfl [vmem:[#allocation1 + $0x10] sm:$0xff pattern:$0x75316420]  ;;  %v1337_v45 = vsub.f32 %v3749_v50, %v4970_v34  ;;  %v4971_v21 = vld [vmem:[#allocation50_spill] sm:$0xff]  ;;  %2877 = vrcp.f32 %v3871_v53  ;;  %v1739_v29 = vmul.f32 %v1707_v22, %v3906_v49  ;;  %v4008_v27 = vld [vmem:[%s3110_s30 + $0x40] sm:$0xff] }
 0x128   : > { %4969 = vst [vmem:[#allocation13_spill] sm:$0xff] %v3939_v18  ;;  %v3941_v28 = vpop.eup %2871  ;;  %v1339_v2 = vsub.f32 %v3758_v37, %v4971_v21  ;;  %v3949_v38 = vld.sshfl [vmem:[#allocation1 + $0x18] sm:$0xff pattern:$0x75316420]  ;;  %v1740_v37 = vmul.f32 %v1708_v8, %v3920_v61  ;;  %v3979_v8 = vadd.f32 1.0, %v3864_v47  ;;  %v1484_v55 = vand.u32 2147483648, %v3857_v1 }
 0x129   : > { %4972 = vst [vmem:[#allocation14_spill] sm:$0xff] %v3949_v38  ;;  %v3951_v5 = vld.sshfl [vmem:[#allocation1 + $0x20] sm:$0xff pattern:$0x75316420]  ;;  %v3953_v10 = vpop.eup %2873  ;;  %v3974_v38 = vor.u32 1.1754944e-38, %v1454_v26  ;;  %vm1418_vm1 = vweird.f32 %v3835_v12  ;;  %v1444_v26 = vmul.f32 %v3941_v28, %v3848_v14  ;;  %2879 = vrcp.f32 %v3873_v19  ;;  %v4019_v49 = vld [vmem:[%s3110_s30 + $0x48] sm:$0xff] }
 0x12a   : > { %4973 = vst [vmem:[#allocation35_spill] sm:$0xff] %v3951_v5  ;;  %v3962_v34 = vld.sshfl [vmem:[#allocation1 + $0x28] sm:$0xff pattern:$0x75316420]  ;;  %v3966_v21 = vpop.eup %2875  ;;  %v1429_v5 = vmul.f32 %v3930_v6, %v3837_v17  ;;  %v3993_v47 = vmul.f32 %v3953_v10, %v3852_v11  ;;  %v3998_v18 = vor.u32 1.1754944e-38, %v1469_v9  ;;  %v4011_v61 = vadd.f32 1.0, %v3891_v0 }
 0x12b   : > { %4974 = vst [vmem:[#allocation36_spill] sm:$0xff] %v3962_v34  ;;  %v3964_v22 = vld.sshfl [vmem:[#allocation1 + $0x30] sm:$0xff pattern:$0x75316420]  ;;  %v3986_v34 = vadd.f32 1.0, %v2860_v41  ;;  %v4002_v41 = vmul.f32 %v3966_v21, %v3857_v1  ;;  %v1710_v42 = vsel %vm478_vm0, %v1335_v24, %v3795_v40  ;;  %v1445_v0 = vsub.f32 1.0, %v1444_v26 }
 0x12c   : > { %4975 = vst [vmem:[#allocation15_spill] sm:$0xff] %v3964_v22  ;;  %v3976_v50 = vld.sshfl [vmem:[#allocation1 + $0x38] sm:$0xff pattern:$0x75316420]  ;;  %v1414_v22 = vmul.f32 %v3917_v51, %v3835_v12  ;;  %v1711_v9 = vsel %vm478_vm0, %v1337_v45, %v3824_v32  ;;  %v1712_v40 = vsel %vm478_vm0, %v1339_v2, %v3855_v7  ;;  %vm1433_vm2 = vweird.f32 %v3837_v17 }
 0x12d   : > { %4976 = vst [vmem:[#allocation37_spill] sm:$0xff] %v3976_v50  ;;  %v4005_v50 = vpop.eup %2877  ;;  %vm1448_vm3 = vweird.f32 %v3848_v14  ;;  %vm1463_vm4 = vweird.f32 %v3852_v11  ;;  %v1742_v32 = vmul.f32 %v1710_v42, %v4019_v49  ;;  %vm1478_vm5 = vweird.f32 %v3857_v1 }
 0x12e   : > { %1975 = vst [vmem:[#allocation1] ss:$2 sm:$0xff] %v1737_v30  ;;  %v3996_v30 = vadd.f32 1.0, %v2862_v56  ;;  %v4013_v56 = vadd.f32 1.0, %v2866_v15  ;;  %v1415_v48 = vsub.f32 1.0, %v1414_v22  ;;  %v1460_v15 = vsub.f32 1.0, %v3993_v47 }
 0x12f   : > { %1976 = vst [vmem:[#allocation1 + $0x10] ss:$2 sm:$0xff] %v1738_v54  ;;  %v1430_v54 = vsub.f32 1.0, %v1429_v5  ;;  %v1489_v5 = vmul.f32 %v4005_v50, %v3871_v53  ;;  %v4043_v22 = vpop.eup %2879  ;;  %vm1419_vm6 = vweird.f32 %v3917_v51  ;;  %v1446_v42 = vmul.f32 %v3941_v28, %v1445_v0 }
 0x130   : > { %1977 = vst [vmem:[#allocation1 + $0x20] ss:$2 sm:$0xff] %v1739_v29  ;;  %v1709_v29 = vsel %vm478_vm0, %v1333_v52, %v3784_v46  ;;  %v4033_v46 = vld [vmem:[%s3110_s30 + $0x58] sm:$0xff]  ;;  %v1475_v52 = vsub.f32 1.0, %v4002_v41  ;;  %v1416_v7 = vmul.f32 %v3917_v51, %v1415_v48  ;;  %vm1493_vm7 = vweird.f32 %v3871_v53  ;;  %vm4105_vm14 = vmor %vm1418_vm1, %vm1419_vm6 }
 0x131   : > { %4977 = vst [vmem:[#allocation16_spill] sm:$0xff] %v3996_v30  ;;  %v4026_v30 = vld [vmem:[%s3110_s30 + $0x50] sm:$0xff]  ;;  %v1741_v24 = vmul.f32 %v1709_v29, %v4008_v27  ;;  %v1431_v2 = vmul.f32 %v3930_v6, %v1430_v54  ;;  %v4988_v54 = vand.u32 2147483647, %v3835_v12  ;;  %vm1434_vm9 = vweird.f32 %v3930_v6 }
 0x132   : > { %1978 = vst [vmem:[#allocation1 + $0x30] ss:$2 sm:$0xff] %v1740_v37  ;;  %v4021_v37 = vor.u32 1.1754944e-38, %v1484_v55  ;;  %v1743_v47 = vmul.f32 %v1711_v9, %v4026_v30  ;;  %2881 = vrcp.f32 %v3881_v20  ;;  %vm1449_vm12 = vweird.f32 %v3941_v28  ;;  %vm4118_vm15 = vmor %vm1433_vm2, %vm1434_vm9 }
 0x133   : > { %4978 = vst [vmem:[#allocation39_spill] sm:$0xff] %v4013_v56  ;;  %v1499_v56 = vand.u32 2147483648, %v3871_v53  ;;  %vm4071_vm8 = vcmp.eq.f32.partialorder %v4988_v54, 8.507059e+37  ;;  %v1504_v54 = vmul.f32 %v4043_v22, %v3873_v19  ;;  %vm1464_vm13 = vweird.f32 %v3953_v10  ;;  %vm4141_vm2 = vmor %vm1448_vm3, %vm1449_vm12 }
 0x134   : > { %4979 = vst [vmem:[#allocation38_spill] sm:$0xff] %v4026_v30  ;;  %2883 = vrcp.f32 %v3896_v57  ;;  %vm1479_vm3 = vweird.f32 %v3966_v21  ;;  %v4178_v30 = vld [vmem:[%s3110_s30 + $0x70] sm:$0xff]  ;;  %vm1494_vm12 = vweird.f32 %v4005_v50 }
 0x135   : > { %4980 = vst [vmem:[#allocation40_spill] sm:$0xff] %v4033_v46  ;;  %v4041_v55 = vld.sshfl [vmem:[#allocation1] sm:$0xff pattern:$0x75316420]  ;;  %2885 = vrcp.f32 %v3908_v43 }
 0x136   : > { %4981 = vst [vmem:[#allocation41_spill] sm:$0xff] %v4041_v55  ;;  %v4049_v45 = vld.sshfl [vmem:[#allocation1 + $0x8] sm:$0xff pattern:$0x75316420]  ;;  %v5000_v55 = vsub.f32 %v3792_v35, %v3839_v33  ;;  %v1476_v35 = vmul.f32 %v3966_v21, %v1475_v52  ;;  %v5009_v52 = vand.u32 2147483647, %v3857_v1  ;;  %2887 = vrcp.f32 %v3922_v58 }
 0x137   : > { %4982 = vst [vmem:[#allocation43_spill] sm:$0xff] %v4049_v45  ;;  %v4051_v26 = vld.sshfl [vmem:[#allocation1 + $0x10] sm:$0xff pattern:$0x75316420]  ;;  %2889 = vrcp.f32 %v3979_v8 }
 0x138   : > { %4983 = vst [vmem:[#allocation17_spill] sm:$0xff] %v4051_v26  ;;  %v4057_v41 = vld.sshfl [vmem:[#allocation1 + $0x18] sm:$0xff pattern:$0x75316420]  ;;  %v1744_v26 = vmul.f32 %v1712_v40, %v4033_v46  ;;  %v4994_v40 = vand.u32 2147483647, %v3848_v14  ;;  %2891 = vrcp.f32 %v3986_v34 }
 0x139   : > { %4984 = vst [vmem:[#allocation18_spill] sm:$0xff] %v4057_v41  ;;  %v4059_v29 = vld.sshfl [vmem:[#allocation1 + $0x20] sm:$0xff pattern:$0x75316420]  ;;  %v1699_v46 = vrot.slane %v5000_v55, 4  ;;  %v4135_v55 = vld [vmem:[%s3110_s30 + $0x60] sm:$0xff] }
 0x13a   : > { %4985 = vst [vmem:[#allocation45_spill] sm:$0xff] %v4059_v29  ;;  %v4065_v45 = vld.sshfl [vmem:[#allocation1 + $0x28] sm:$0xff pattern:$0x75316420]  ;;  %v4991_v29 = vand.u32 2147483647, %v3837_v17  ;;  %v5006_v17 = vsub.f32 %v3831_v63, %v3846_v16 }
 0x13b   : > { %4986 = vst [vmem:[#allocation19_spill] sm:$0xff] %v4065_v45  ;;  %v4067_v48 = vld.sshfl [vmem:[#allocation1 + $0x30] sm:$0xff pattern:$0x75316420]  ;;  %vm4084_vm11 = vcmp.eq.f32.partialorder %v4994_v40, 8.507059e+37  ;;  %vm4147_vm6 = vcmp.eq.f32.partialorder %v5009_v52, 8.507059e+37 }
 0x13c   : > { %4987 = vst [vmem:[#allocation20_spill] sm:$0xff] %v4067_v48  ;;  %vm4078_vm10 = vcmp.eq.f32.partialorder %v4991_v29, 8.507059e+37  ;;  %v1490_v48 = vsub.f32 1.0, %v1489_v5  ;;  %v4091_v41 = vld.sshfl [vmem:[#allocation1 + $0x38] sm:$0xff pattern:$0x75316420]  ;;  %v4099_v5 = vadd.f32 %v3917_v51, %v1416_v7 }
 0x13d   : > { %4997 = vst [vmem:[#allocation21_spill] sm:$0xff] %v4091_v41  ;;  %v4095_v29 = vor.u32 1.1754944e-38, %v1499_v56  ;;  %v1512_v40 = vand.u32 2147483647, %v3873_v19  ;;  %v1461_v56 = vmul.f32 %v3953_v10, %v1460_v15  ;;  %v5003_v7 = vand.u32 2147483647, %v3852_v11 }
 0x13e   : > { %1987 = vst [vmem:[#allocation1] ss:$2 sm:$0xff] %v1741_v24  ;;  %v1432_v24 = vadd.f32 %v3930_v6, %v1431_v2  ;;  %v1700_v33 = vrot.slane %v5006_v17, 4  ;;  %v1491_v63 = vmul.f32 %v4005_v50, %v1490_v48  ;;  %v5012_v16 = vand.u32 2147483647, %v3871_v53  ;;  %v4165_v17 = vld [vmem:[%s3110_s30 + $0x68] sm:$0xff] }
 0x13f   : > { %1988 = vst [vmem:[#allocation1 + $0x10] ss:$2 sm:$0xff] %v1742_v32  ;;  %v1447_v32 = vadd.f32 %v3941_v28, %v1446_v42  ;;  %vm4125_vm1 = vcmp.eq.f32.partialorder %v5003_v7, 8.507059e+37  ;;  %v1505_v14 = vsub.f32 1.0, %v1504_v54  ;;  %v5015_v42 = vsub.f32 %v3765_v60, %v3803_v23 }
 0x140   : > { %1989 = vst [vmem:[#allocation1 + $0x20] ss:$2 sm:$0xff] %v1743_v47  ;;  %vm4154_vm9 = vcmp.eq.f32.partialorder %v5012_v16, 8.507059e+37  ;;  %v1514_v48 = vand.u32 2147483648, %v3873_v19  ;;  %v5016_v54 = vsub.f32 %v3774_v59, %v3822_v62  ;;  %v4175_v16 = vpop.eup %2881  ;;  %v1421_v60 = vsel %vm4105_vm14, %v3917_v51, %v4099_v5  ;;  %vm4203_vm14 = vmor %vm1463_vm4, %vm1464_vm13 }
 0x141   : > { %1990 = vst [vmem:[#allocation1 + $0x30] ss:$2 sm:$0xff] %v1744_v26  ;;  %v1713_v7 = vsel %vm478_vm0, %v5015_v42, %v3860_v31  ;;  %v1436_v23 = vsel %vm4118_vm15, %v3930_v6, %v1432_v24  ;;  %v5017_v59 = vsub.f32 %v3780_v36, %v3833_v13  ;;  %v4193_v31 = vld [vmem:[%s3110_s30 + $0x78] sm:$0xff]  ;;  %v1462_v41 = vadd.f32 %v3953_v10, %v1461_v56  ;;  %vm4219_vm15 = vmor %vm1478_vm5, %vm1479_vm3 }
 0x142   : > { %v1714_v52 = vsel %vm478_vm0, %v5016_v54, %v3862_v25  ;;  %v1451_v25 = vsel %vm4141_vm2, %v3941_v28, %v1447_v32  ;;  %v5020_v36 = vsub.f32 %v3820_v39, %v3841_v3  ;;  %v1745_v51 = vmul.f32 %v1713_v7, %v4135_v55  ;;  %v4234_v32 = vpop.eup %2883  ;;  %vm4240_vm5 = vmor %vm1493_vm7, %vm1494_vm12  ;;  %v5046_v3 = vld [vmem:[#allocation29_spill] sm:$0xff] }
 0x143   : > { %v1715_v62 = vsel %vm478_vm0, %v5017_v59, %v1699_v46  ;;  %v1477_v28 = vadd.f32 %v3966_v21, %v1476_v35  ;;  %v1492_v5 = vadd.f32 %v4005_v50, %v1491_v63  ;;  %v1506_v39 = vmul.f32 %v4043_v22, %v1505_v14  ;;  %v4251_v63 = vpop.eup %2885 }
 0x144   : > { %v1716_v13 = vsel %vm478_vm0, %v5020_v36, %v1700_v33  ;;  %vm4225_vm4 = vcmp.eq.f32.partialorder %v1512_v40, 8.507059e+37  ;;  %v1746_v24 = vmul.f32 %v1714_v52, %v4165_v17  ;;  %v1519_v40 = vmul.f32 %v4175_v16, %v3881_v20  ;;  %v4261_v7 = vpop.eup %2887 }
 0x145   : > { %v4212_v46 = vld.sshfl [vmem:[#allocation1] sm:$0xff pattern:$0x75316420]  ;;  %v4230_v56 = vld.sshfl [vmem:[#allocation1 + $0x8] sm:$0xff pattern:$0x75316420]  ;;  %v1747_v35 = vmul.f32 %v1715_v62, %v4178_v30  ;;  %vm1508_vm13 = vweird.f32 %v3873_v19  ;;  %vm1509_vm2 = vweird.f32 %v4043_v22  ;;  %v1748_v53 = vmul.f32 %v1716_v13, %v4193_v31 }
 0x146   : > { %5021 = vst [vmem:[#allocation47_spill] sm:$0xff] %v4212_v46  ;;  %v4232_v12 = vld.sshfl [vmem:[#allocation1 + $0x10] sm:$0xff pattern:$0x75316420]  ;;  %v4266_v54 = vsel %vm4071_vm8, %v3875_v4, %v1421_v60  ;;  %v4271_v52 = vsel %vm4078_vm10, %v3883_v44, %v1436_v23  ;;  %v4276_v59 = vsel %vm4084_vm11, %v3974_v38, %v1451_v25  ;;  %v1466_v62 = vsel %vm4203_vm14, %v3953_v10, %v1462_v41  ;;  %vm4295_vm7 = vmor %vm1508_vm13, %vm1509_vm2 }
 0x147   : > { %5026 = vst [vmem:[#allocation22_spill] sm:$0xff] %v4230_v56  ;;  %v4247_v33 = vld.sshfl [vmem:[#allocation1 + $0x18] sm:$0xff pattern:$0x75316420]  ;;  %v1481_v4 = vsel %vm4219_vm15, %v3966_v21, %v1477_v28  ;;  %v1496_v44 = vsel %vm4240_vm5, %v4005_v50, %v1492_v5  ;;  %v1507_v9 = vadd.f32 %v4043_v22, %v1506_v39  ;;  %v1529_v38 = vand.u32 2147483648, %v3881_v20  ;;  %v5039_v39 = vld [vmem:[#allocation27_spill] sm:$0xff] }
 0x148   : > { %5027 = vst [vmem:[#allocation49_spill] sm:$0xff] %v4232_v12  ;;  %v4249_v2 = vld.sshfl [vmem:[#allocation1 + $0x20] sm:$0xff pattern:$0x75316420]  ;;  %v1515_v45 = vor.u32 1.1754944e-38, %v1514_v48  ;;  %v1520_v0 = vsub.f32 1.0, %v1519_v40  ;;  %v1534_v50 = vmul.f32 %v4234_v32, %v3896_v57  ;;  %v4305_v60 = vsel %vm4125_vm1, %v3998_v18, %v1466_v62  ;;  %v4324_v18 = vpop.eup %2889 }
 0x149   : > { %5030 = vst [vmem:[#allocation23_spill] sm:$0xff] %v4247_v33  ;;  %v4257_v14 = vld.sshfl [vmem:[#allocation1 + $0x28] sm:$0xff pattern:$0x75316420]  ;;  %v1527_v21 = vand.u32 2147483647, %v3881_v20  ;;  %v1549_v19 = vmul.f32 %v4251_v63, %v3908_v43  ;;  %v1564_v48 = vmul.f32 %v4261_v7, %v3922_v58  ;;  %v4315_v25 = vsel %vm4147_vm6, %v4021_v37, %v1481_v4 }
 0x14a   : > { %5031 = vst [vmem:[#allocation24_spill] sm:$0xff] %v4249_v2  ;;  %v4259_v42 = vld.sshfl [vmem:[#allocation1 + $0x30] sm:$0xff pattern:$0x75316420]  ;;  %v1544_v23 = vand.u32 2147483648, %v3896_v57  ;;  %v4320_v15 = vsel %vm4154_vm9, %v4095_v29, %v1496_v44  ;;  %vm1523_vm8 = vweird.f32 %v3881_v20  ;;  %v1511_v41 = vsel %vm4295_vm7, %v4043_v22, %v1507_v9  ;;  %v5076_v33 = vld [vmem:[#allocation11_spill] sm:$0xff] }
 0x14b   : > { %5032 = vst [vmem:[#allocation51_spill] sm:$0xff] %v4257_v14  ;;  %v4281_v36 = vld.sshfl [vmem:[#allocation1 + $0x38] sm:$0xff pattern:$0x75316420]  ;;  %v4329_v6 = vor.u32 1.1754944e-38, %v1529_v38  ;;  %v1521_v26 = vmul.f32 %v4175_v16, %v1520_v0  ;;  %vm4334_vm10 = vcmp.eq.f32.partialorder %v1527_v21, 8.507059e+37  ;;  %v4348_v40 = vsel %vm4225_vm4, %v1515_v45, %v1511_v41  ;;  %v4368_v0 = vpop.eup %2891 }
 0x14c   : > { %5033 = vst [vmem:[#allocation25_spill] sm:$0xff] %v4259_v42  ;;  %v1542_v37 = vand.u32 2147483647, %v3896_v57  ;;  %v1557_v47 = vand.u32 2147483647, %v3908_v43  ;;  %v1535_v13 = vsub.f32 1.0, %v1534_v50  ;;  %vm1524_vm11 = vweird.f32 %v4175_v16 }
 0x14d   : > { %5034 = vst [vmem:[#allocation26_spill] sm:$0xff] %v4281_v36  ;;  %v1572_v28 = vand.u32 2147483647, %v3922_v58  ;;  %v4340_v11 = vor.u32 1.1754944e-38, %v1544_v23  ;;  %v1550_v22 = vsub.f32 1.0, %v1549_v19  ;;  %v1565_v5 = vsub.f32 1.0, %v1564_v48  ;;  %vm4387_vm3 = vmor %vm1523_vm8, %vm1524_vm11 }
 0x14e   : > { %1999 = vst [vmem:[#allocation1] ss:$2 sm:$0xff] %v1745_v51  ;;  %v1559_v51 = vand.u32 2147483648, %v3908_v43  ;;  %vm1538_vm1 = vweird.f32 %v3896_v57  ;;  %vm1553_vm6 = vweird.f32 %v3908_v43  ;;  %v5045_v9 = vld [vmem:[#allocation16_spill] sm:$0xff]  ;;  %v1767_v38 = vadd.f32 %v4276_v59, %v5046_v3  ;;  %v5051_v19 = vld [vmem:[#allocation30_spill] sm:$0xff] }
 0x14f   : > { %2000 = vst [vmem:[#allocation1 + $0x10] ss:$2 sm:$0xff] %v1746_v24  ;;  %v1765_v24 = vadd.f32 %v4266_v54, %v5039_v39  ;;  %2893 = vrcp.f32 %v5045_v9  ;;  %v1522_v21 = vadd.f32 %v4175_v16, %v1521_v26  ;;  %v1536_v50 = vmul.f32 %v4234_v32, %v1535_v13 }
 0x150   : > { %2001 = vst [vmem:[#allocation1 + $0x20] ss:$2 sm:$0xff] %v1747_v35  ;;  %v1579_v35 = vmul.f32 %v4324_v18, %v3979_v8  ;;  %vm4372_vm9 = vcmp.eq.f32.partialorder %v1542_v37, 8.507059e+37  ;;  %2895 = vrcp.f32 %v4011_v61  ;;  %v1768_v48 = vadd.f32 %v4305_v60, %v5051_v19 }
 0x151   : > { %2002 = vst [vmem:[#allocation1 + $0x30] ss:$2 sm:$0xff] %v1748_v53  ;;  %v5042_v53 = vld [vmem:[#allocation28_spill] sm:$0xff]  ;;  %v1551_v37 = vmul.f32 %v4251_v63, %v1550_v22  ;;  %vm1568_vm12 = vweird.f32 %v3922_v58  ;;  %v1574_v13 = vand.u32 2147483648, %v3922_v58  ;;  %vm1539_vm14 = vweird.f32 %v4234_v32 }
 0x152   : > { %5041 = vst [vmem:[#allocation44_spill] sm:$0xff] %v4348_v40  ;;  %v1766_v62 = vadd.f32 %v4271_v52, %v5042_v53  ;;  %v1587_v20 = vand.u32 2147483647, %v3979_v8  ;;  %vm1554_vm15 = vweird.f32 %v4251_v63  ;;  %vm4401_vm4 = vcmp.eq.f32.partialorder %v1557_v47, 8.507059e+37  ;;  %vm4424_vm13 = vmor %vm1538_vm1, %vm1539_vm14 }
 0x153   : > { %vm4414_vm5 = vcmp.eq.f32.partialorder %v1572_v28, 8.507059e+37  ;;  %vm1583_vm2 = vweird.f32 %v3979_v8  ;;  %vm4437_vm7 = vmor %vm1553_vm6, %vm1554_vm15  ;;  %vm1569_vm8 = vweird.f32 %v4261_v7  ;;  %vm1584_vm1 = vweird.f32 %v4324_v18 }
 0x154   : > { %vm4443_vm11 = vcmp.eq.f32.partialorder %v1587_v20, 8.507059e+37  ;;  %vm1598_vm6 = vweird.f32 %v3986_v34  ;;  %vm1613_vm14 = vweird.f32 %v5045_v9  ;;  %vm1628_vm15 = vweird.f32 %v4011_v61 }
 0x155   : > { %v4344_v1 = vld.sshfl [vmem:[#allocation1] sm:$0xff pattern:$0x75316420]  ;;  %v4355_v4 = vld.sshfl [vmem:[#allocation1 + $0x8] sm:$0xff pattern:$0x75316420]  ;;  %v4418_v47 = vpop.eup %2893 }
 0x156   : > { %5040 = vst [vmem:[#allocation42_spill] sm:$0xff] %v4344_v1  ;;  %v4357_v44 = vld.sshfl [vmem:[#allocation1 + $0x10] sm:$0xff pattern:$0x75316420]  ;;  %v4407_v1 = vmul.f32 %v4368_v0, %v3986_v34 }
 0x157   : > { %5043 = vst [vmem:[#allocation46_spill] sm:$0xff] %v4355_v4  ;;  %v4364_v10 = vld.sshfl [vmem:[#allocation1 + $0x18] sm:$0xff pattern:$0x75316420]  ;;  %v1560_v4 = vor.u32 1.1754944e-38, %v1559_v51 }
 0x158   : > { %5044 = vst [vmem:[#allocation48_spill] sm:$0xff] %v4357_v44  ;;  %v4366_v45 = vld.sshfl [vmem:[#allocation1 + $0x20] sm:$0xff pattern:$0x75316420]  ;;  %v1595_v43 = vsub.f32 1.0, %v4407_v1 }
 0x159   : > { %5047 = vst [vmem:[#allocation50_spill] sm:$0xff] %v4364_v10  ;;  %v4379_v41 = vld.sshfl [vmem:[#allocation1 + $0x28] sm:$0xff pattern:$0x75316420] }
 0x15a   : > { %5048 = vst [vmem:[#allocation27_spill] sm:$0xff] %v4366_v45  ;;  %v4381_v10 = vld.sshfl [vmem:[#allocation1 + $0x30] sm:$0xff pattern:$0x75316420]  ;;  %v5056_v45 = vld [vmem:[#allocation39_spill] sm:$0xff] }
 0x15b   : > { %5052 = vst [vmem:[#allocation28_spill] sm:$0xff] %v4379_v41  ;;  %2897 = vrcp.f32 %v5056_v45  ;;  %v4395_v44 = vld.sshfl [vmem:[#allocation1 + $0x38] sm:$0xff pattern:$0x75316420]  ;;  %v1589_v41 = vand.u32 2147483648, %v3979_v8 }
 0x15c   : > { %5053 = vst [vmem:[#allocation16_spill] sm:$0xff] %v4381_v10  ;;  %v1580_v10 = vsub.f32 1.0, %v1579_v35  ;;  %v1537_v35 = vadd.f32 %v4234_v32, %v1536_v50 }
 0x15d   : > { %5057 = vst [vmem:[#allocation29_spill] sm:$0xff] %v4395_v44 }
 0x15e   : > { %2142 = vst [vmem:[#allocation1] ss:$2 sm:$0xff] %v1765_v24  ;;  %v1526_v24 = vsel %vm4387_vm3, %v4175_v16, %v1522_v21  ;;  %v1552_v16 = vadd.f32 %v4251_v63, %v1551_v37  ;;  %v1581_v57 = vmul.f32 %v4324_v18, %v1580_v10  ;;  %v1541_v10 = vsel %vm4424_vm13, %v4234_v32, %v1537_v35  ;;  %v5072_v35 = vld [vmem:[#allocation32_spill] sm:$0xff]  ;;  %vm4496_vm3 = vmor %vm1583_vm2, %vm1584_vm1 }
 0x15f   : > { %2144 = vst [vmem:[#allocation1 + $0x10] ss:$2 sm:$0xff] %v1766_v62  ;;  %v1566_v62 = vmul.f32 %v4261_v7, %v1565_v5  ;;  %v4431_v5 = vpop.eup %2895  ;;  %v4452_v37 = vsel %vm4334_vm10, %v4329_v6, %v1526_v24  ;;  %vm4471_vm10 = vmor %vm1568_vm12, %vm1569_vm8  ;;  %v1609_v32 = vmul.f32 %v4418_v47, %v5045_v9  ;;  %v4490_v2 = vsel %vm4372_vm9, %v4340_v11, %v1541_v10 }
 0x160   : > { %2146 = vst [vmem:[#allocation1 + $0x20] ss:$2 sm:$0xff] %v1767_v38  ;;  %v1575_v38 = vor.u32 1.1754944e-38, %v1574_v13  ;;  %v1556_v1 = vsel %vm4437_vm7, %v4251_v63, %v1552_v16  ;;  %v1582_v13 = vadd.f32 %v4324_v18, %v1581_v57  ;;  %v1624_v63 = vmul.f32 %v4431_v5, %v4011_v61  ;;  %v5073_v16 = vld [vmem:[#allocation33_spill] sm:$0xff] }
 0x161   : > { %2148 = vst [vmem:[#allocation1 + $0x30] ss:$2 sm:$0xff] %v1768_v48  ;;  %v1590_v48 = vor.u32 1.1754944e-38, %v1589_v41  ;;  %v4447_v26 = vpop.eup %2897  ;;  %v1567_v20 = vadd.f32 %v4261_v7, %v1566_v62  ;;  %v5069_v41 = vld [vmem:[#allocation31_spill] sm:$0xff]  ;;  %v1770_v62 = vadd.f32 %v4320_v15, %v5072_v35  ;;  %v1771_v21 = vadd.f32 %v4348_v40, %v5073_v16 }
 0x162   : > { %5068 = vst [vmem:[#allocation30_spill] sm:$0xff] %v4452_v37  ;;  %v1769_v36 = vadd.f32 %v4315_v25, %v5069_v41  ;;  %v1639_v58 = vmul.f32 %v4447_v26, %v5056_v45  ;;  %vm1599_vm12 = vweird.f32 %v4368_v0  ;;  %v1772_v12 = vadd.f32 %v4452_v37, %v5076_v33 }
 0x163   : > { %v1571_v11 = vsel %vm4471_vm10, %v4261_v7, %v1567_v20  ;;  %v4512_v40 = vsel %vm4401_vm4, %v1560_v4, %v1556_v1  ;;  %v1610_v16 = vsub.f32 1.0, %v1609_v32  ;;  %v1619_v37 = vand.u32 2147483648, %v5045_v9  ;;  %vm4552_vm13 = vmor %vm1598_vm6, %vm1599_vm12 }
 0x164   : > { %v1586_v7 = vsel %vm4496_vm3, %v4324_v18, %v1582_v13  ;;  %v1640_v20 = vsub.f32 1.0, %v1639_v58  ;;  %v1596_v4 = vmul.f32 %v4368_v0, %v1595_v43  ;;  %vm1614_vm9 = vweird.f32 %v4418_v47 }
 0x165   : > { %v2149_v29 = vld.sshfl [vmem:[#allocation1] sm:$0xff pattern:$0x75316420]  ;;  %v2150_v6 = vld.sshfl [vmem:[#allocation1 + $0x8] sm:$0xff pattern:$0x75316420]  ;;  %v1611_v44 = vmul.f32 %v4418_v47, %v1610_v16  ;;  %vm1629_vm4 = vweird.f32 %v4431_v5  ;;  %v1774_v58 = vadd.f32 %v4512_v40, %v4019_v49  ;;  %vm1644_vm2 = vweird.f32 %v4447_v26  ;;  %vm4564_vm7 = vmor %vm1613_vm14, %vm1614_vm9 }
 0x166   : > { %v2151_v51 = vld.sshfl [vmem:[#allocation1 + $0x10] sm:$0xff pattern:$0x75316420]  ;;  %v2152_v28 = vld.sshfl [vmem:[#allocation1 + $0x18] sm:$0xff pattern:$0x75316420]  ;;  %vm4577_vm8 = vmor %vm1628_vm15, %vm1629_vm4 }
 0x167   : > { %v2153_v42 = vld.sshfl [vmem:[#allocation1 + $0x20] sm:$0xff pattern:$0x75316420]  ;;  %v2154_v14 = vld.sshfl [vmem:[#allocation1 + $0x28] sm:$0xff pattern:$0x75316420] }
 0x168   : > { %v2155_v56 = vld.sshfl [vmem:[#allocation1 + $0x30] sm:$0xff pattern:$0x75316420]  ;;  %v2156_v46 = vld.sshfl [vmem:[#allocation1 + $0x38] sm:$0xff pattern:$0x75316420] }
 0x169   : > { %2157 = vst [vmem:[#allocation1] ss:$2 sm:$0xff] %v1769_v36  ;;  %v2225_v8 = vsel %vm478_vm0, %v2149_v29, 0.0  ;;  %v2226_v23 = vsel %vm478_vm0, %v2150_v6, 0.0  ;;  %v2228_v10 = vsel %vm478_vm0, %v2151_v51, 0.0  ;;  %v1625_v36 = vsub.f32 1.0, %v1624_v63 }
 0x16a   : > { %2158 = vst [vmem:[#allocation1 + $0x10] ss:$2 sm:$0xff] %v1770_v62  ;;  %v2227_v33 = vadd.f32 %v2226_v23, %v2225_v8  ;;  %v2230_v29 = vsel %vm478_vm0, %v2152_v28, 0.0  ;;  %v4521_v6 = vsel %vm4414_vm5, %v1575_v38, %v1571_v11  ;;  %v1632_v1 = vand.u32 2147483647, %v4011_v61 }
 0x16b   : > { %2159 = vst [vmem:[#allocation1 + $0x20] ss:$2 sm:$0xff] %v1771_v21  ;;  %v1634_v18 = vand.u32 2147483648, %v4011_v61  ;;  %v2232_v13 = vsel %vm478_vm0, %v2153_v42, 0.0  ;;  %v4531_v28 = vsel %vm4443_vm11, %v1590_v48, %v1586_v7  ;;  %v1647_v38 = vand.u32 2147483647, %v5056_v45 }
 0x16c   : > { %2160 = vst [vmem:[#allocation1 + $0x30] ss:$2 sm:$0xff] %v1772_v12  ;;  %v2229_v22 = vadd.f32 %v2228_v10, %v2227_v33  ;;  %v1626_v12 = vmul.f32 %v4431_v5, %v1625_v36  ;;  %v1641_v33 = vmul.f32 %v4447_v26, %v1640_v20  ;;  %v1649_v24 = vand.u32 2147483648, %v5056_v45  ;;  %v5083_v36 = vld [vmem:[#allocation40_spill] sm:$0xff] }
 0x16d   : > { %5077 = vst [vmem:[#allocation39_spill] sm:$0xff] %v4531_v28  ;;  %v2234_v32 = vsel %vm478_vm0, %v2154_v14, 0.0  ;;  %v1773_v42 = vadd.f32 %v4490_v2, %v4008_v27  ;;  %v2236_v48 = vsel %vm478_vm0, %v2155_v56, 0.0  ;;  %v2238_v51 = vsel %vm478_vm0, %v2156_v46, 0.0  ;;  %v5080_v56 = vld [vmem:[#allocation38_spill] sm:$0xff] }
 0x16e   : > { %v2231_v43 = vadd.f32 %v2230_v29, %v2229_v22  ;;  %v1597_v63 = vadd.f32 %v4368_v0, %v1596_v4  ;;  %vm1643_vm5 = vweird.f32 %v5056_v45  ;;  %v1612_v46 = vadd.f32 %v4418_v47, %v1611_v44 }
 0x16f   : > { %v1775_v57 = vadd.f32 %v4521_v6, %v5080_v56  ;;  %v1627_v7 = vadd.f32 %v4431_v5, %v1626_v12  ;;  %v1776_v20 = vadd.f32 %v4531_v28, %v5083_v36  ;;  %v5084_v22 = vand.u32 2147483648, %v3986_v34  ;;  %vm4591_vm1 = vmor %vm1643_vm5, %vm1644_vm2 }
 0x170   : > { %v2161_v62 = vld.sshfl [vmem:[#allocation1] sm:$0xff pattern:$0x75316420]  ;;  %v2233_v50 = vadd.f32 %v2232_v13, %v2231_v43  ;;  %v2162_v16 = vld.sshfl [vmem:[#allocation1 + $0x8] sm:$0xff pattern:$0x75316420]  ;;  %v1642_v43 = vadd.f32 %v4447_v26, %v1641_v33 }
 0x171   : > { %v2163_v14 = vld.sshfl [vmem:[#allocation1 + $0x10] sm:$0xff pattern:$0x75316420]  ;;  %v2164_v11 = vld.sshfl [vmem:[#allocation1 + $0x18] sm:$0xff pattern:$0x75316420]  ;;  %v1631_v45 = vsel %vm4577_vm8, %v4431_v5, %v1627_v7 }
 0x172   : > { %v2165_v8 = vld.sshfl [vmem:[#allocation1 + $0x20] sm:$0xff pattern:$0x75316420]  ;;  %v2235_v23 = vadd.f32 %v2234_v32, %v2233_v50  ;;  %v2166_v29 = vld.sshfl [vmem:[#allocation1 + $0x28] sm:$0xff pattern:$0x75316420]  ;;  %v1601_v50 = vsel %vm4552_vm13, %v4368_v0, %v1597_v63 }
 0x173   : > { %v2167_v4 = vld.sshfl [vmem:[#allocation1 + $0x30] sm:$0xff pattern:$0x75316420]  ;;  %v1605_v13 = vor.u32 1.1754944e-38, %v5084_v22  ;;  %2169 = vst [vmem:[#allocation1] ss:$2 sm:$0xff] %v1773_v42  ;;  %v1616_v42 = vsel %vm4564_vm7, %v4418_v47, %v1612_v46  ;;  %v1646_v47 = vsel %vm4591_vm1, %v4447_v26, %v1642_v43 }
 0x174   : > { %v2168_v32 = vld.sshfl [vmem:[#allocation1 + $0x38] sm:$0xff pattern:$0x75316420]  ;;  %v2237_v12 = vadd.f32 %v2236_v48, %v2235_v23  ;;  %v5087_v28 = vand.u32 2147483647, %v3986_v34  ;;  %v1620_v22 = vor.u32 1.1754944e-38, %v1619_v37 }
 0x175   : > { %2170 = vst [vmem:[#allocation1 + $0x10] ss:$2 sm:$0xff] %v1774_v58  ;;  %v2240_v33 = vsel %vm478_vm0, %v2161_v62, 0.0  ;;  %v5090_v0 = vand.u32 2147483647, %v5045_v9  ;;  %v1635_v34 = vor.u32 1.1754944e-38, %v1634_v18 }
 0x176   : > { %vm1603_vm11 = vcmp.eq.f32.partialorder %v5087_v28, 8.507059e+37  ;;  %2171 = vst [vmem:[#allocation1 + $0x20] ss:$2 sm:$0xff] %v1775_v57  ;;  %v2239_v37 = vadd.f32 %v2238_v51, %v2237_v12  ;;  %vm1633_vm6 = vcmp.eq.f32.partialorder %v1632_v1, 8.507059e+37  ;;  %v1650_v28 = vor.u32 1.1754944e-38, %v1649_v24 }
 0x177   : > { %vm1618_vm10 = vcmp.eq.f32.partialorder %v5090_v0, 8.507059e+37  ;;  %2172 = vst [vmem:[#allocation1 + $0x30] ss:$2 sm:$0xff] %v1776_v20  ;;  %v2242_v48 = vsel %vm478_vm0, %v2162_v16, 0.0  ;;  %v4605_v62 = vsel %vm1603_vm11, %v1605_v13, %v1601_v50  ;;  %vm1648_vm3 = vcmp.eq.f32.partialorder %v1647_v38, 8.507059e+37 }
 0x178   : > { %v2241_v9 = vadd.f32 %v2240_v33, %v2239_v37  ;;  %v4610_v18 = vsel %vm1618_vm10, %v1620_v22, %v1616_v42  ;;  %v2244_v51 = vsel %vm478_vm0, %v2163_v14, 0.0  ;;  %v4613_v63 = vsel %vm1633_vm6, %v1635_v34, %v1631_v45 }
 0x179   : > { %v4615_v1 = vsel %vm1648_vm3, %v1650_v28, %v1646_v47  ;;  %v1777_v24 = vadd.f32 %v4605_v62, %v4135_v55  ;;  %v2246_v16 = vsel %vm478_vm0, %v2164_v11, 0.0  ;;  %v2248_v21 = vsel %vm478_vm0, %v2165_v8, 0.0 }
 0x17a   : > { %v2243_v5 = vadd.f32 %v2242_v48, %v2241_v9  ;;  %v2173_v58 = vld.sshfl [vmem:[#allocation1] sm:$0xff pattern:$0x75316420]  ;;  %v1778_v26 = vadd.f32 %v4610_v18, %v4165_v17  ;;  %v2174_v38 = vld.sshfl [vmem:[#allocation1 + $0x8] sm:$0xff pattern:$0x75316420]  ;;  %v1779_v14 = vadd.f32 %v4613_v63, %v4178_v30  ;;  %v1780_v7 = vadd.f32 %v4615_v1, %v4193_v31 }
 0x17b   : > { %2181 = vst [vmem:[#allocation1] ss:$2 sm:$0xff] %v1777_v24  ;;  %v2250_v8 = vsel %vm478_vm0, %v2166_v29, 0.0  ;;  %v2252_v12 = vsel %vm478_vm0, %v2167_v4, 0.0  ;;  %v2254_v22 = vsel %vm478_vm0, %v2168_v32, 0.0  ;;  %v2256_v33 = vsel %vm478_vm0, %v2173_v58, 0.0 }
 0x17c   : > { %v2175_v46 = vld.sshfl [vmem:[#allocation1 + $0x10] sm:$0xff pattern:$0x75316420]  ;;  %v2245_v57 = vadd.f32 %v2244_v51, %v2243_v5  ;;  %v2176_v23 = vld.sshfl [vmem:[#allocation1 + $0x18] sm:$0xff pattern:$0x75316420]  ;;  %v1749_v29 = vmul.f32 %v4266_v54, %v5039_v39  ;;  %v1750_v4 = vmul.f32 %v4271_v52, %v5042_v53  ;;  %v1751_v9 = vmul.f32 %v4276_v59, %v5046_v3 }
 0x17d   : > { %v2177_v10 = vld.sshfl [vmem:[#allocation1 + $0x20] sm:$0xff pattern:$0x75316420]  ;;  %v2178_v20 = vld.sshfl [vmem:[#allocation1 + $0x28] sm:$0xff pattern:$0x75316420]  ;;  %v1752_v24 = vmul.f32 %v4305_v60, %v5051_v19  ;;  %v1753_v60 = vmul.f32 %v4315_v25, %v5069_v41 }
 0x17e   : > { %v2179_v13 = vld.sshfl [vmem:[#allocation1 + $0x30] sm:$0xff pattern:$0x75316420]  ;;  %v2247_v44 = vadd.f32 %v2246_v16, %v2245_v57  ;;  %v2180_v11 = vld.sshfl [vmem:[#allocation1 + $0x38] sm:$0xff pattern:$0x75316420] }
 0x17f   : > { %2182 = vst [vmem:[#allocation1 + $0x10] ss:$2 sm:$0xff] %v1778_v26  ;;  %v2258_v34 = vsel %vm478_vm0, %v2174_v38, 0.0  ;;  %v2260_v37 = vsel %vm478_vm0, %v2175_v46, 0.0  ;;  %v2262_v39 = vsel %vm478_vm0, %v2176_v23, 0.0  ;;  %v2264_v53 = vsel %vm478_vm0, %v2177_v10, 0.0 }
 0x180   : > { %v2249_v43 = vadd.f32 %v2248_v21, %v2247_v44  ;;  %2183 = vst [vmem:[#allocation1 + $0x20] ss:$2 sm:$0xff] %v1779_v14  ;;  %v2266_v59 = vsel %vm478_vm0, %v2178_v20, 0.0  ;;  %v2268_v21 = vsel %vm478_vm0, %v2179_v13, 0.0  ;;  %v1754_v38 = vmul.f32 %v4320_v15, %v5072_v35  ;;  %v5091_v23 = vld [vmem:[#allocation33_spill] sm:$0xff]  ;;  %v5092_v10 = vld [vmem:[#allocation44_spill] sm:$0xff] }
 0x181   : > { %2184 = vst [vmem:[#allocation1 + $0x30] ss:$2 sm:$0xff] %v1780_v7  ;;  %v2270_v14 = vsel %vm478_vm0, %v2180_v11, 0.0  ;;  %v1755_v7 = vmul.f32 %v5092_v10, %v5091_v23  ;;  %vm2108_vm12 = vcmask 3072  }
 0x182   : > { %v2251_v50 = vadd.f32 %v2250_v8, %v2249_v43  ;;  %v2185_v42 = vld.sshfl [vmem:[#allocation1] sm:$0xff pattern:$0x75316420]  ;;  %v2186_v45 = vld.sshfl [vmem:[#allocation1 + $0x8] sm:$0xff pattern:$0x75316420] }
 0x183   : > { %2332 = vst [vmem:[#allocation1] ss:$2 sm:$0xff] %v1749_v29  ;;  %v5093_v8 = vld [vmem:[#allocation11_spill] sm:$0xff]  ;;  %v5094_v43 = vld [vmem:[#allocation30_spill] sm:$0xff]  ;;  %v2272_v25 = vsel %vm478_vm0, %v2185_v42, 0.0 }
 0x184   : > { %v2253_v61 = vadd.f32 %v2252_v12, %v2251_v50  ;;  %v1756_v13 = vmul.f32 %v5094_v43, %v5093_v8 }
 0x186   : > { %v2255_v0 = vadd.f32 %v2254_v22, %v2253_v61  ;;  %v2187_v28 = vld.sshfl [vmem:[#allocation1 + $0x10] sm:$0xff pattern:$0x75316420]  ;;  %v2188_v48 = vld.sshfl [vmem:[#allocation1 + $0x18] sm:$0xff pattern:$0x75316420] }
 0x187   : > { %v2189_v47 = vld.sshfl [vmem:[#allocation1 + $0x20] sm:$0xff pattern:$0x75316420]  ;;  %v2190_v51 = vld.sshfl [vmem:[#allocation1 + $0x28] sm:$0xff pattern:$0x75316420] }
 0x188   : > { %v2257_v32 = vadd.f32 %v2256_v33, %v2255_v0  ;;  %v4639_v5 = vld.sshfl [vmem:[#allocation1 + $0x30] sm:$0xff pattern:$0x75316420]  ;;  %v4643_v58 = vld.sshfl [vmem:[#allocation1 + $0x38] sm:$0xff pattern:$0x75316420] }
 0x189   : > { %2334 = vst [vmem:[#allocation1 + $0x10] ss:$2 sm:$0xff] %v1750_v4  ;;  %v2274_v22 = vsel %vm478_vm0, %v2186_v45, 0.0  ;;  %v2276_v29 = vsel %vm478_vm0, %v2187_v28, 0.0  ;;  %v1758_v28 = vmul.f32 %v4512_v40, %v4019_v49  ;;  %v2284_v49 = vsel %vm478_vm0, %v4639_v5, 0.0 }
 0x18a   : > { %v2259_v54 = vadd.f32 %v2258_v34, %v2257_v32  ;;  %2336 = vst [vmem:[#allocation1 + $0x20] ss:$2 sm:$0xff] %v1751_v9  ;;  %v2339_v19 = vld.sshfl [vmem:[#allocation1] sm:$0xff pattern:$0x75316420] }
 0x18b   : > { %2338 = vst [vmem:[#allocation1 + $0x30] ss:$2 sm:$0xff] %v1752_v24  ;;  %v2340_v46 = vld.sshfl [vmem:[#allocation1 + $0x8] sm:$0xff pattern:$0x75316420]  ;;  %v2415_v41 = vsel %vm478_vm0, %v2339_v19, 0.0 }
 0x18c   : > { %v2261_v52 = vadd.f32 %v2260_v37, %v2259_v54  ;;  %2347 = vst [vmem:[#allocation1] ss:$2 sm:$0xff] %v1753_v60  ;;  %v2416_v15 = vsel %vm478_vm0, %v2340_v46, 0.0  ;;  %v2278_v24 = vsel %vm478_vm0, %v2188_v48, 0.0  ;;  %v1759_v60 = vmul.f32 %v4521_v6, %v5080_v56 }
 0x18d   : > { %v2417_v33 = vadd.f32 %v2416_v15, %v2415_v41  ;;  %v1763_v15 = vmul.f32 %v4613_v63, %v4178_v30 }
 0x18e   : > { %v2263_v16 = vadd.f32 %v2262_v39, %v2261_v52  ;;  %v2280_v39 = vsel %vm478_vm0, %v2189_v47, 0.0  ;;  %v1757_v52 = vmul.f32 %v4490_v2, %v4008_v27  ;;  %v5095_v27 = vld [vmem:[#allocation39_spill] sm:$0xff] }
 0x18f   : > { %v1760_v2 = vmul.f32 %v5095_v27, %v5083_v36  ;;  %v2286_v36 = vsel %vm478_vm0, %v4643_v58, 0.0  ;;  %v5100_v27 = vld [vmem:[#allocation35_spill] sm:$0xff] }
 0x190   : > { %v2265_v3 = vadd.f32 %v2264_v53, %v2263_v16  ;;  %v2341_v57 = vld.sshfl [vmem:[#allocation1 + $0x10] sm:$0xff pattern:$0x75316420]  ;;  %v2342_v44 = vld.sshfl [vmem:[#allocation1 + $0x18] sm:$0xff pattern:$0x75316420] }
 0x191   : > { %v2343_v12 = vld.sshfl [vmem:[#allocation1 + $0x20] sm:$0xff pattern:$0x75316420]  ;;  %v2344_v50 = vld.sshfl [vmem:[#allocation1 + $0x28] sm:$0xff pattern:$0x75316420] }
 0x192   : > { %v2267_v26 = vadd.f32 %v2266_v59, %v2265_v3  ;;  %v2418_v35 = vsel %vm478_vm0, %v2341_v57, 0.0  ;;  %v2345_v61 = vld.sshfl [vmem:[#allocation1 + $0x30] sm:$0xff pattern:$0x75316420]  ;;  %2348 = vst [vmem:[#allocation1 + $0x10] ss:$2 sm:$0xff] %v1754_v38 }
 0x193   : > { %v2346_v0 = vld.sshfl [vmem:[#allocation1 + $0x38] sm:$0xff pattern:$0x75316420]  ;;  %2349 = vst [vmem:[#allocation1 + $0x20] ss:$2 sm:$0xff] %v1755_v7  ;;  %v2420_v34 = vsel %vm478_vm0, %v2342_v44, 0.0  ;;  %v2419_v42 = vadd.f32 %v2418_v35, %v2417_v33 }
 0x194   : > { %v2269_v20 = vadd.f32 %v2268_v21, %v2267_v26  ;;  %2350 = vst [vmem:[#allocation1 + $0x30] ss:$2 sm:$0xff] %v1756_v13  ;;  %v2422_v4 = vsel %vm478_vm0, %v2343_v12, 0.0  ;;  %v2424_v45 = vsel %vm478_vm0, %v2344_v50, 0.0  ;;  %v2282_v16 = vsel %vm478_vm0, %v2190_v51, 0.0 }
 0x195   : > { %v2421_v9 = vadd.f32 %v2420_v34, %v2419_v42  ;;  %v2351_v59 = vld.sshfl [vmem:[#allocation1] sm:$0xff pattern:$0x75316420]  ;;  %v2426_v3 = vsel %vm478_vm0, %v2345_v61, 0.0  ;;  %v2428_v21 = vsel %vm478_vm0, %v2346_v0, 0.0  ;;  %v1761_v13 = vmul.f32 %v4605_v62, %v4135_v55 }
 0x196   : > { %v2271_v11 = vadd.f32 %v2270_v14, %v2269_v20  ;;  %v2352_v19 = vld.sshfl [vmem:[#allocation1 + $0x8] sm:$0xff pattern:$0x75316420]  ;;  %v2430_v23 = vsel %vm478_vm0, %v2351_v59, 0.0  ;;  %v1762_v50 = vmul.f32 %v4610_v18, %v4165_v17  ;;  %v5098_v59 = vld [vmem:[#allocation13_spill] sm:$0xff] }
 0x197   : > { %v2423_v53 = vadd.f32 %v2422_v4, %v2421_v9  ;;  %2359 = vst [vmem:[#allocation1] ss:$2 sm:$0xff] %v1757_v52  ;;  %v2432_v7 = vsel %vm478_vm0, %v2352_v19, 0.0  ;;  %v5097_v52 = vld [vmem:[#allocation12_spill] sm:$0xff] }
 0x198   : > { %v2273_v37 = vadd.f32 %v2272_v25, %v2271_v11 }
 0x199   : > { %v2353_v47 = vld.sshfl [vmem:[#allocation1 + $0x10] sm:$0xff pattern:$0x75316420]  ;;  %v2425_v26 = vadd.f32 %v2424_v45, %v2423_v53  ;;  %v2354_v38 = vld.sshfl [vmem:[#allocation1 + $0x18] sm:$0xff pattern:$0x75316420] }
 0x19a   : > { %v2275_v32 = vadd.f32 %v2274_v22, %v2273_v37  ;;  %v2355_v51 = vld.sshfl [vmem:[#allocation1 + $0x20] sm:$0xff pattern:$0x75316420]  ;;  %v2356_v40 = vld.sshfl [vmem:[#allocation1 + $0x28] sm:$0xff pattern:$0x75316420]  ;;  %v1764_v22 = vmul.f32 %v4615_v1, %v4193_v31 }
 0x19b   : > { %v2427_v57 = vadd.f32 %v2426_v3, %v2425_v26  ;;  %v2357_v14 = vld.sshfl [vmem:[#allocation1 + $0x30] sm:$0xff pattern:$0x75316420]  ;;  %2360 = vst [vmem:[#allocation1 + $0x10] ss:$2 sm:$0xff] %v1758_v28  ;;  %v2434_v5 = vsel %vm478_vm0, %v2353_v47, 0.0 }
 0x19c   : > { %v2277_v54 = vadd.f32 %v2276_v29, %v2275_v32  ;;  %v2358_v56 = vld.sshfl [vmem:[#allocation1 + $0x38] sm:$0xff pattern:$0x75316420]  ;;  %2361 = vst [vmem:[#allocation1 + $0x20] ss:$2 sm:$0xff] %v1759_v60  ;;  %v2436_v12 = vsel %vm478_vm0, %v2354_v38, 0.0 }
 0x19d   : > { %v2429_v10 = vadd.f32 %v2428_v21, %v2427_v57  ;;  %2362 = vst [vmem:[#allocation1 + $0x30] ss:$2 sm:$0xff] %v1760_v2  ;;  %v2438_v41 = vsel %vm478_vm0, %v2355_v51, 0.0  ;;  %v2440_v0 = vsel %vm478_vm0, %v2356_v40, 0.0  ;;  %v2442_v37 = vsel %vm478_vm0, %v2357_v14, 0.0  ;;  %v5101_v40 = vld [vmem:[#allocation36_spill] sm:$0xff] }
 0x19e   : > { %v2279_v48 = vadd.f32 %v2278_v24, %v2277_v54  ;;  %v2363_v25 = vld.sshfl [vmem:[#allocation1] sm:$0xff pattern:$0x75316420]  ;;  %v2364_v35 = vld.sshfl [vmem:[#allocation1 + $0x8] sm:$0xff pattern:$0x75316420] }
 0x19f   : > { %v2431_v20 = vadd.f32 %v2430_v23, %v2429_v10  ;;  %2371 = vst [vmem:[#allocation1] ss:$2 sm:$0xff] %v1761_v13  ;;  %v2444_v63 = vsel %vm478_vm0, %v2358_v56, 0.0  ;;  %v2446_v31 = vsel %vm478_vm0, %v2363_v25, 0.0  ;;  %v2448_v29 = vsel %vm478_vm0, %v2364_v35, 0.0  ;;  %v5096_v54 = vld [vmem:[#allocation34_spill] sm:$0xff] }
 0x1a0   : > { %v2281_v46 = vadd.f32 %v2280_v39, %v2279_v48  ;;  %v2043_v39 = vsel %vm478_vm0, %v5096_v54, 0.0  ;;  %v2044_v53 = vsel %vm478_vm0, %v5097_v52, 0.0  ;;  %v2046_v3 = vsel %vm478_vm0, %v5098_v59, 0.0  ;;  %v5099_v48 = vld [vmem:[#allocation14_spill] sm:$0xff]  ;;  %v5102_v10 = vld [vmem:[#allocation15_spill] sm:$0xff] }
 0x1a1   : > { %v2433_v43 = vadd.f32 %v2432_v7, %v2431_v20  ;;  %v2045_v28 = vadd.f32 %v2044_v53, %v2043_v39  ;;  %v2048_v60 = vsel %vm478_vm0, %v5099_v48, 0.0  ;;  %v2050_v2 = vsel %vm478_vm0, %v5100_v27, 0.0  ;;  %v5109_v53 = vld [vmem:[#allocation19_spill] sm:$0xff] }
 0x1a2   : > { %v2283_v6 = vadd.f32 %v2282_v16, %v2281_v46  ;;  %v2365_v11 = vld.sshfl [vmem:[#allocation1 + $0x10] sm:$0xff pattern:$0x75316420]  ;;  %v2366_v61 = vld.sshfl [vmem:[#allocation1 + $0x18] sm:$0xff pattern:$0x75316420] }
 0x1a3   : > { %v2435_v58 = vadd.f32 %v2434_v5, %v2433_v43  ;;  %v2367_v55 = vld.sshfl [vmem:[#allocation1 + $0x20] sm:$0xff pattern:$0x75316420]  ;;  %v2368_v33 = vld.sshfl [vmem:[#allocation1 + $0x28] sm:$0xff pattern:$0x75316420]  ;;  %v2047_v47 = vadd.f32 %v2046_v3, %v2045_v28 }
 0x1a4   : > { %v2285_v44 = vadd.f32 %v2284_v49, %v2283_v6  ;;  %v2369_v17 = vld.sshfl [vmem:[#allocation1 + $0x30] sm:$0xff pattern:$0x75316420]  ;;  %2372 = vst [vmem:[#allocation1 + $0x10] ss:$2 sm:$0xff] %v1762_v50  ;;  %v2450_v32 = vsel %vm478_vm0, %v2365_v11, 0.0 }
 0x1a5   : > { %v2437_v62 = vadd.f32 %v2436_v12, %v2435_v58  ;;  %v2370_v34 = vld.sshfl [vmem:[#allocation1 + $0x38] sm:$0xff pattern:$0x75316420]  ;;  %2373 = vst [vmem:[#allocation1 + $0x20] ss:$2 sm:$0xff] %v1763_v15  ;;  %v2452_v24 = vsel %vm478_vm0, %v2366_v61, 0.0  ;;  %v2049_v51 = vadd.f32 %v2048_v60, %v2047_v47 }
 0x1a6   : > { %v2287_v8 = vadd.f32 %v2286_v36, %v2285_v44  ;;  %2374 = vst [vmem:[#allocation1 + $0x30] ss:$2 sm:$0xff] %v1764_v22  ;;  %v2454_v16 = vsel %vm478_vm0, %v2367_v55, 0.0  ;;  %v2456_v19 = vsel %vm478_vm0, %v2368_v33, 0.0  ;;  %v2458_v38 = vsel %vm478_vm0, %v2369_v17, 0.0  ;;  %v5104_v58 = vld [vmem:[#allocation41_spill] sm:$0xff] }
 0x1a7   : > { %v2439_v18 = vadd.f32 %v2438_v41, %v2437_v62  ;;  %v2375_v46 = vld.sshfl [vmem:[#allocation1] sm:$0xff pattern:$0x75316420]  ;;  %v2052_v57 = vsel %vm478_vm0, %v5101_v40, 0.0  ;;  %v2460_v14 = vsel %vm478_vm0, %v2370_v34, 0.0  ;;  %v2051_v23 = vadd.f32 %v2050_v2, %v2049_v51  ;;  %v5105_v61 = vld [vmem:[#allocation43_spill] sm:$0xff] }
 0x1a8   : > { %2288 = vadd.xlane.f32.xlu0 %v2287_v8  ;;  %v2376_v6 = vld.sshfl [vmem:[#allocation1 + $0x8] sm:$0xff pattern:$0x75316420]  ;;  %v2054_v36 = vsel %vm478_vm0, %v5102_v10, 0.0  ;;  %v2462_v7 = vsel %vm478_vm0, %v2375_v46, 0.0  ;;  %v5103_v8 = vld [vmem:[#allocation37_spill] sm:$0xff] }
 0x1a9   : > { %v2441_v30 = vadd.f32 %v2440_v0, %v2439_v18  ;;  %v2053_v44 = vadd.f32 %v2052_v57, %v2051_v23  ;;  %v2056_v43 = vsel %vm478_vm0, %v5103_v8, 0.0  ;;  %v2464_v13 = vsel %vm478_vm0, %v2376_v6, 0.0  ;;  %v5106_v18 = vld [vmem:[#allocation17_spill] sm:$0xff]  ;;  %v5112_v2 = vld [vmem:[#allocation47_spill] sm:$0xff]  ;;  %v5113_v46 = vld [vmem:[#allocation22_spill] sm:$0xff] }
 0x1aa   : > { %v2058_v41 = vsel %vm478_vm0, %v5104_v58, 0.0  ;;  %v2060_v55 = vsel %vm478_vm0, %v5105_v61, 0.0  ;;  %v2062_v34 = vsel %vm478_vm0, %v5106_v18, 0.0  ;;  %v5111_v47 = vld [vmem:[#allocation21_spill] sm:$0xff]  ;;  %v5115_v6 = vld [vmem:[#allocation23_spill] sm:$0xff] }
 0x1ab   : > { %v2443_v42 = vadd.f32 %v2442_v37, %v2441_v30  ;;  %v2377_v20 = vld.sshfl [vmem:[#allocation1 + $0x10] sm:$0xff pattern:$0x75316420]  ;;  %v2055_v12 = vadd.f32 %v2054_v36, %v2053_v44  ;;  %v2378_v50 = vld.sshfl [vmem:[#allocation1 + $0x18] sm:$0xff pattern:$0x75316420] }
 0x1ac   : > { %v2466_v15 = vsel %vm478_vm0, %v2377_v20, 0.0  ;;  %v2379_v11 = vld.sshfl [vmem:[#allocation1 + $0x20] sm:$0xff pattern:$0x75316420]  ;;  %v2468_v62 = vsel %vm478_vm0, %v2378_v50, 0.0  ;;  %v5114_v57 = vld [vmem:[#allocation49_spill] sm:$0xff] }
 0x1ad   : > { %v2445_v1 = vadd.f32 %v2444_v63, %v2443_v42  ;;  %v2057_v35 = vadd.f32 %v2056_v43, %v2055_v12  ;;  %v2380_v0 = vld.sshfl [vmem:[#allocation1 + $0x28] sm:$0xff pattern:$0x75316420]  ;;  %v2470_v37 = vsel %vm478_vm0, %v2379_v11, 0.0  ;;  %v5116_v36 = vld [vmem:[#allocation24_spill] sm:$0xff]  ;;  %v5118_v43 = vld [vmem:[#allocation25_spill] sm:$0xff] }
 0x1ae   : > { %v2381_v63 = vld.sshfl [vmem:[#allocation1 + $0x30] sm:$0xff pattern:$0x75316420]  ;;  %v5117_v20 = vld [vmem:[#allocation51_spill] sm:$0xff]  ;;  %v5119_v50 = vld [vmem:[#allocation26_spill] sm:$0xff] }
 0x1af   : > { %v2447_v4 = vadd.f32 %v2446_v31, %v2445_v1  ;;  %v2059_v33 = vadd.f32 %v2058_v41, %v2057_v35  ;;  %v5107_v31 = vld [vmem:[#allocation18_spill] sm:$0xff]  ;;  %v2474_v54 = vsel %vm478_vm0, %v2381_v63, 0.0  ;;  %v5125_v63 = vld [vmem:[#allocation28_spill] sm:$0xff] }
 0x1b0   : > { %v2064_v1 = vsel %vm478_vm0, %v5107_v31, 0.0  ;;  %v5120_v41 = vld [vmem:[#allocation42_spill] sm:$0xff] }
 0x1b1   : > { %v2449_v9 = vadd.f32 %v2448_v29, %v2447_v4  ;;  %v2061_v30 = vadd.f32 %v2060_v55, %v2059_v33  ;;  %v2472_v29 = vsel %vm478_vm0, %v2380_v0, 0.0  ;;  %v5121_v11 = vld [vmem:[#allocation46_spill] sm:$0xff]  ;;  %v5122_v55 = vld [vmem:[#allocation48_spill] sm:$0xff] }
 0x1b2   : > { %v5123_v0 = vld [vmem:[#allocation50_spill] sm:$0xff] }
 0x1b3   : > { %v2451_v45 = vadd.f32 %v2450_v32, %v2449_v9  ;;  %v2063_v4 = vadd.f32 %v2062_v34, %v2061_v30  ;;  %v2382_v32 = vld.sshfl [vmem:[#allocation1 + $0x38] sm:$0xff pattern:$0x75316420]  ;;  %v5124_v34 = vld [vmem:[#allocation27_spill] sm:$0xff] }
 0x1b4   : > { %v2476_v28 = vsel %vm478_vm0, %v2382_v32, 0.0  ;;  %v5127_v32 = vld [vmem:[#allocation29_spill] sm:$0xff] }
 0x1b5   : > { %v2453_v21 = vadd.f32 %v2452_v24, %v2451_v45  ;;  %v5108_v24 = vld [vmem:[#allocation45_spill] sm:$0xff]  ;;  %v2065_v39 = vadd.f32 %v2064_v1, %v2063_v4  ;;  %v5126_v1 = vld [vmem:[#allocation16_spill] sm:$0xff] }
 0x1b6   : > { %v2066_v45 = vsel %vm478_vm0, %v5108_v24, 0.0 }
 0x1b7   : > { %v2455_v26 = vadd.f32 %v2454_v16, %v2453_v21  ;;  %v2068_v16 = vsel %vm478_vm0, %v5109_v53, 0.0  ;;  %v2067_v59 = vadd.f32 %v2066_v45, %v2065_v39  ;;  %v5110_v21 = vld [vmem:[#allocation20_spill] sm:$0xff] }
 0x1b8   : > { %v2070_v48 = vsel %vm478_vm0, %v5110_v21, 0.0 }
 0x1b9   : > { %v2457_v49 = vadd.f32 %v2456_v19, %v2455_v26  ;;  %v2069_v60 = vadd.f32 %v2068_v16, %v2067_v59  ;;  %v2072_v26 = vsel %vm478_vm0, %v5111_v47, 0.0 }
 0x1bb   : > { %v2459_v56 = vadd.f32 %v2458_v38, %v2457_v49  ;;  %v2071_v27 = vadd.f32 %v2070_v48, %v2069_v60  ;;  %v2074_v38 = vsel %vm478_vm0, %v5112_v2, 0.0  ;;  %v2076_v49 = vsel %vm478_vm0, %v5113_v46, 0.0 }
 0x1bd   : > { %v2461_v5 = vadd.f32 %v2460_v14, %v2459_v56  ;;  %v2073_v51 = vadd.f32 %v2072_v26, %v2071_v27  ;;  %v2078_v14 = vsel %vm478_vm0, %v5114_v57, 0.0  ;;  %v2080_v56 = vsel %vm478_vm0, %v5115_v6, 0.0 }
 0x1bf   : > { %v2463_v25 = vadd.f32 %v2462_v7, %v2461_v5  ;;  %v2075_v40 = vadd.f32 %v2074_v38, %v2073_v51  ;;  %v2082_v7 = vsel %vm478_vm0, %v5116_v36, 0.0  ;;  %v2084_v5 = vsel %vm478_vm0, %v5117_v20, 0.0 }
 0x1c1   : > { %v2465_v22 = vadd.f32 %v2464_v13, %v2463_v25  ;;  %v2077_v23 = vadd.f32 %v2076_v49, %v2075_v40  ;;  %v2086_v13 = vsel %vm478_vm0, %v5118_v43, 0.0  ;;  %v2088_v25 = vsel %vm478_vm0, %v5119_v50, 0.0 }
 0x1c3   : > { %v2467_v17 = vadd.f32 %v2466_v15, %v2465_v22  ;;  %v2079_v10 = vadd.f32 %v2078_v14, %v2077_v23  ;;  %v2090_v15 = vsel %vm478_vm0, %v5120_v41, 0.0  ;;  %v2092_v22 = vsel %vm478_vm0, %v5121_v11, 0.0 }
 0x1c5   : > { %v2469_v42 = vadd.f32 %v2468_v62, %v2467_v17  ;;  %v2081_v44 = vadd.f32 %v2080_v56, %v2079_v10  ;;  %v2094_v62 = vsel %vm478_vm0, %v5122_v55, 0.0  ;;  %v2096_v17 = vsel %vm478_vm0, %v5123_v0, 0.0 }
 0x1c7   : > { %v2471_v9 = vadd.f32 %v2470_v37, %v2469_v42  ;;  %v2083_v8 = vadd.f32 %v2082_v7, %v2081_v44  ;;  %v2098_v37 = vsel %vm478_vm0, %v5124_v34, 0.0  ;;  %v2100_v42 = vsel %vm478_vm0, %v5125_v63, 0.0 }
 0x1c9   : > { %v2473_v52 = vadd.f32 %v2472_v29, %v2471_v9  ;;  %v2085_v12 = vadd.f32 %v2084_v5, %v2083_v8  ;;  %v2102_v29 = vsel %vm478_vm0, %v5126_v1, 0.0  ;;  %v2104_v9 = vsel %vm478_vm0, %v5127_v32, 0.0 }
 0x1ca   : > { %vm2298_vm0 = vcmask 0  }
 0x1cb   : > { %v2475_v3 = vadd.f32 %v2474_v54, %v2473_v52  ;;  %v2087_v58 = vadd.f32 %v2086_v13, %v2085_v12 }
 0x1cd   : > { %v2477_v19 = vadd.f32 %v2476_v28, %v2475_v3  ;;  %v2089_v35 = vadd.f32 %v2088_v25, %v2087_v58 }
 0x1cf   : > { %2478 = vadd.xlane.f32.xlu0 %v2477_v19  ;;  %v2091_v61 = vadd.f32 %v2090_v15, %v2089_v35 }
 0x1d1   : > { %v2093_v33 = vadd.f32 %v2092_v22, %v2091_v61 }
 0x1d3   : > { %v2095_v18 = vadd.f32 %v2094_v62, %v2093_v33 }
 0x1d5   : > { %v2097_v30 = vadd.f32 %v2096_v17, %v2095_v18 }
 0x1d7   : > { %v2099_v31 = vadd.f32 %v2098_v37, %v2097_v30 }
 0x1d9   : > { %v2101_v4 = vadd.f32 %v2100_v42, %v2099_v31 }
 0x1db   : > { %v2103_v24 = vadd.f32 %v2102_v29, %v2101_v4 }
 0x1dd   : > { %v2105_v45 = vadd.f32 %v2104_v9, %v2103_v24 }
 0x1df   : > { %2106 = vadd.xlane.f32.xlu1 %v2105_v45 }
 0x21b   : > { %v2289_v54 = vpop.xlane.xlu0 %2288 }
 0x21c   : > { %v2290_v39 = vrot.slane %v2289_v54, 4 }
 0x21e   : > { %v2291_v52 = vadd.f32 %v2290_v39, %v2289_v54 }
 0x220   : > { %v2292_v53 = vrot.slane %v2291_v52, 2 }
 0x222   : > { %v2293_v16 = vadd.f32 %v2292_v53, %v2291_v52 }
 0x224   : > { %v2294_v28 = vrot.slane %v2293_v16, 1 }
 0x226   : > { %v2295_v59 = vadd.f32 %v2294_v28, %v2293_v16 }
 0x228   : > { %2675 = vpush %v2295_v59 }
 0x242   : > { %v2479_v3 = vpop.xlane.xlu0 %2478 }
 0x243   : > { %v2480_v21 = vrot.slane %v2479_v3, 4 }
 0x245   : > { %v2481_v48 = vadd.f32 %v2480_v21, %v2479_v3 }
 0x247   : > { %v2482_v60 = vrot.slane %v2481_v48, 2 }
 0x249   : > { %v2483_v19 = vadd.f32 %v2482_v60, %v2481_v48 }
 0x24b   : > { %v2484_v47 = vrot.slane %v2483_v19, 1 }
 0x24d   : > { %v2485_v26 = vadd.f32 %v2484_v47, %v2483_v19 }
 0x24f   : > { %2677 = vpush %v2485_v26 }
 0x252   : > { %v2107_v2 = vpop.xlane.xlu1 %2106 }
 0x253   : > { %2109 = vst.msk [vmem:[%s288_s13] sm:$0xf] %vm2108_vm12, %v2107_v2 }
 0x259   : > { %s2676_s9 = spop %2675 }
 0x25a   : > { %v2297_v27 = vstv %s2676_s9 }
 0x25b   : > { %2299 = vst.msk [vmem:[%s291_s8] sm:$0x1] %vm2298_vm0, %v2297_v27 }
 0x280   : > { %s2678_s23 = spop %2677 }
 0x281   : > { %v2487_v38 = vstv %s2678_s23 }
 0x282   : > { %2488 = vst.msk [vmem:[%s294_s21] sm:$0x1] %vm2298_vm0, %v2487_v38 }
 0x283 PF: > { %s21_s20 = sadd.s32 1, %s3013_s20   ;;  %s5128_s15 = smov %s2997_s16 }
 0x284   : > { %p18_p0 = scmp.ge.s32.totalorder %s21_s20, 4   ;;  %s5129_s16 = smov %s3001_s17 }
 0x285   : > { %s5130_s17 = smov %s3089_s27  ;;  %s5131_s18 = smov %s3009_s19 }
 0x286   : > { %s5132_s19 = smov %s5134_s22  ;;  %20 = sbr.rel (!%p18_p0) target bundleno = 6 (0x6), region = 131 }
 0x28b   :  { %2532 = vsyncpa [#allocation6], 1 }
 0x28c   :  { %2534 = vsyncpa [#allocation6 + $0x1], 1 }
 0x28d   :  { %2535 = vsyncpa [#allocation8], 1 }
 0x28e   :  { %2537 = vsyncpa [#allocation8 + $0x1], 1 }

</bundles_post_ra>
